<compile_context>
chip_gen: v6e
topology: v6e:2x2x1
jax: 0.10.0
libtpu: 0.0.40
codegen_flags: <defaults>
</compile_context>

<pallas_src>
import jax
import jax.numpy as jnp
import numpy as np
from jax import lax
from jax.experimental import pallas as pl
from jax.experimental.pallas import tpu as pltpu


# ----------------------------------------------------------------------------
# Pallas kernel
# ----------------------------------------------------------------------------
def _lstm_cell(gates, c_prev, hw):
    """LSTM nonlinearity; gate lanes ordered [i | f | o | g], each `hw` wide.

    Sigmoid gates are contiguous (one EUP region) and the tanh gate is last.
    Works both for a single direction (hw = H) and for the fused layer-1
    fwd|bwd state (hw = 2*H1 with per-gate [fwd | bwd] lanes).
    """
    sig = jax.nn.sigmoid(gates[:, : 3 * hw])
    i_g = sig[:, :hw]
    f_g = sig[:, hw:2 * hw]
    o_g = sig[:, 2 * hw:3 * hw]
    g_g = jnp.tanh(gates[:, 3 * hw:])
    c_new = f_g * c_prev + i_g * g_g
    h_new = o_g * jnp.tanh(c_new)
    return h_new, c_new


def _lstmnet_kernel(
    # ---- inputs (all VMEM resident) ----
    x2_ref,                               # (T*B, 2*I) bf16, row block t = [x[t] | x[T-1-t]]
    wih1_ref, b1_ref, whh1_ref,           # fused layer-1 weights (both directions)
    wih2f_ref, whh2f_ref, b2f_ref,        # layer-2 forward
    wih2b_ref, b2b_ref,                   # layer-2 backward (W_hh unused: h0 == 0)
    w1f_ref, w1b_ref, bfc1_ref, w2_ref,   # head: fc1 split in two, fc2 (no bias)
    # ---- output ----
    out_ref,                              # (B, O) f32
    # ---- VMEM scratch ----
    gx1_ref,                              # (T*B, 8*H1) hoisted x-projection, both dirs
    gx2_ref,                              # (T*B, 4*H2) hoisted layer-2-fwd projection
    y1_ref,                               # (T*B, 2*H1) layer-1 sequence output [fwd|bwd]
):
    f32, bf16 = jnp.float32, jnp.bfloat16
    TB = x2_ref.shape[0]
    B = out_ref.shape[0]
    T = TB // B
    H1 = whh1_ref.shape[0] // 2
    W1 = 2 * H1                           # fused fwd|bwd hidden width
    H2 = whh2f_ref.shape[0]
    UNROLL = min(T, 8)                    # bounded unroll (full at demo T=8)

    def rows(t):
        return pl.ds(pl.multiple_of(t * B, B), B)

    # Recurrent weights are tiny: load them into values ONCE, out of the loops.
    whh1 = whh1_ref[...]
    whh2f = whh2f_ref[...]

    # ---------------- Layer 1: ONE hoisted input projection ------------------
    # gx1 row-block t = [x[t] | x[T-1-t]] @ striped W  ->  fwd gates for step t
    # and bwd gates for step T-1-t, already in the per-gate [fwd|bwd] layout.
    gx1_ref[...] = (jnp.dot(x2_ref[...], wih1_ref[...],
                            preferred_element_type=f32) + b1_ref[...])

    # ---------------- Layer 1: both directions in ONE serial loop ------------
    zero1 = jnp.zeros((B, W1), f32)

    def l1_step(s, carry):
        h, c = carry                                         # (B, 2*H1) [fwd|bwd]
        gates = gx1_ref[rows(s), :] + jnp.dot(
            h.astype(bf16), whh1, preferred_element_type=f32)
        h, c = _lstm_cell(gates, c, W1)
        y1_ref[rows(s), pl.ds(0, H1)] = h[:, :H1]            # fwd out at time s
        y1_ref[rows(T - 1 - s), pl.ds(H1, H1)] = h[:, H1:]   # bwd out at time T-1-s
        return (h, c)

    lax.fori_loop(0, T, l1_step, (zero1, zero1), unroll=UNROLL)

    # ---------------- Layer 2 forward (only the final h is consumed) ---------
    y1_bf = y1_ref[...].astype(bf16)
    gx2_ref[...] = (jnp.dot(y1_bf, wih2f_ref[...],
                            preferred_element_type=f32) + b2f_ref[...])

    zero2 = jnp.zeros((B, H2), f32)

    def l2_step(t, carry):
        h, c = carry
        gates = gx2_ref[rows(t), :] + jnp.dot(
            h.astype(bf16), whh2f, preferred_element_type=f32)
        return _lstm_cell(gates, c, H2)

    h2f, _ = lax.fori_loop(0, T, l2_step, (zero2, zero2), unroll=UNROLL)

    # ---------------- Layer 2 backward: single cell step ---------------------
    # fx[-1] only needs the backward output at t = T-1, i.e. the FIRST step of
    # the reversed scan with zero initial state, so one cell step on y1[T-1]
    # suffices (and h0 == 0 makes the W_hh term vanish entirely).
    y1_last = y1_ref[rows(T - 1), :].astype(bf16)
    gates_b = (jnp.dot(y1_last, wih2b_ref[...],
                       preferred_element_type=f32) + b2b_ref[...])
    h2b, _ = _lstm_cell(gates_b, zero2, H2)

    # ---------------- Head: fc2(tanh(fc1([h2f | h2b]))) ----------------------
    # fc1 weight split at wrapper time -> no lane-axis concat in the kernel.
    # TODO(synk): the original prints tensor sizes and dumps fx[-1] to disk
    # (LSS_txt); host-side I/O has no Pallas equivalent and is skipped.
    hid = jnp.tanh(
        jnp.dot(h2f.astype(bf16), w1f_ref[...], preferred_element_type=f32)
        + jnp.dot(h2b.astype(bf16), w1b_ref[...], preferred_element_type=f32)
        + bfc1_ref[...])
    out_ref[...] = jnp.dot(hid.astype(bf16), w2_ref[...],
                           preferred_element_type=f32)


# ----------------------------------------------------------------------------
# Wrapper-time weight preparation (gate permutation, direction fusion, bf16)
# ----------------------------------------------------------------------------
def _perm_ifgo_to_ifog(w, H):
    """Reorder gate columns from PyTorch [i, f, g, o] to [i, f, o, g]."""
    return jnp.concatenate([w[:, :2 * H], w[:, 3 * H:], w[:, 2 * H:3 * H]],
                           axis=-1)


def _interleave_dirs(wf, wb, H):
    """(n,4H),(n,4H) -> (n,8H): per-gate [fwd | bwd] lane blocks."""
    n = wf.shape[0]
    return jnp.stack([wf.reshape(n, 4, H), wb.reshape(n, 4, H)],
                     axis=2).reshape(n, 8 * H)


def _prepare_kernel_params(p):
    """Canonical PyTorch-style params -> fused / permuted / bf16 kernel operands."""
    bf16 = jnp.bfloat16
    wih1f, whh1f, b1f = p["lstm1_f"]
    wih1b, whh1b, b1b = p["lstm1_b"]
    wih2f, whh2f, b2f = p["lstm2_f"]
    wih2b, _whh2b, b2b = p["lstm2_b"]      # layer-2 bwd W_hh never reaches fx[-1]
    H1 = whh1f.shape[0]
    H2 = whh2f.shape[0]

    # Gate order [i, f, o, g]: sigmoid gates contiguous, tanh gate last.
    wih1f_p, wih1b_p = _perm_ifgo_to_ifog(wih1f, H1), _perm_ifgo_to_ifog(wih1b, H1)
    whh1f_p, whh1b_p = _perm_ifgo_to_ifog(whh1f, H1), _perm_ifgo_to_ifog(whh1b, H1)
    b1f_p, b1b_p = _perm_ifgo_to_ifog(b1f, H1), _perm_ifgo_to_ifog(b1b, H1)

    # Fused layer-1 input weight (2I, 8H1): rows [0:I] drive fwd gate lanes,
    # rows [I:2I] drive bwd gate lanes (LHS is the doubled [x[t] | x[T-1-t]]).
    zi = jnp.zeros_like(wih1f_p)
    wih1_fused = jnp.concatenate([_interleave_dirs(wih1f_p, zi, H1),
                                  _interleave_dirs(zi, wih1b_p, H1)], axis=0)
    # Striped block recurrent weight (2H1, 8H1): fwd-h rows feed fwd gate
    # lanes, bwd-h rows feed bwd gate lanes -> ONE matmul for both directions.
    zh = jnp.zeros_like(whh1f_p)
    whh1_blk = jnp.concatenate([_interleave_dirs(whh1f_p, zh, H1),
                                _interleave_dirs(zh, whh1b_p, H1)], axis=0)
    b1_fused = _interleave_dirs(b1f_p, b1b_p, H1)

    wih2f_p = _perm_ifgo_to_ifog(wih2f, H2)
    whh2f_p = _perm_ifgo_to_ifog(whh2f, H2)
    b2f_p = _perm_ifgo_to_ifog(b2f, H2)
    wih2b_p = _perm_ifgo_to_ifog(wih2b, H2)
    b2b_p = _perm_ifgo_to_ifog(b2b, H2)

    w1_t = p["fc1_w_t"]                    # (2*H2, FC)
    w1f, w1b = w1_t[:H2], w1_t[H2:]        # split -> no concat of [h2f | h2b]

    # bf16 for every MXU operand; f32 biases / accumulation / cell state.
    return (wih1_fused.astype(bf16), b1_fused, whh1_blk.astype(bf16),
            wih2f_p.astype(bf16), whh2f_p.astype(bf16), b2f_p,
            wih2b_p.astype(bf16), b2b_p,
            w1f.astype(bf16), w1b.astype(bf16), p["fc1_b"],
            p["fc2_w_t"].astype(bf16))


def lstmnet_forward(x, params):
    """Mirrors LSTMNet.forward (h0/c0 in the original are unused). x: (T,B,I)."""
    T, B, I = x.shape
    H1 = params["lstm1_f"][1].shape[0]
    H2 = params["lstm2_f"][1].shape[0]
    O = params["fc2_w_t"].shape[1]
    assert B % 8 == 0, "batch must be a multiple of the f32 sublane tile (8)"

    kparams = _prepare_kernel_params(params)

    # Doubled time-major input: row block t = [x[t] | x[T-1-t]] so ONE matmul
    # hoists both directions' input projections.
    x2 = jnp.concatenate([x, x[::-1]], axis=-1).reshape(T * B, 2 * I)
    x2 = x2.astype(jnp.bfloat16)

    vmem = pl.BlockSpec(memory_space=pltpu.MemorySpace.VMEM)
    scratch_shapes = [
        pltpu.VMEM((T * B, 8 * H1), jnp.float32),   # gx1 (both directions)
        pltpu.VMEM((T * B, 4 * H2), jnp.float32),   # gx2 (layer-2 fwd)
        pltpu.VMEM((T * B, 2 * H1), jnp.float32),   # y1  (layer-1 output)
    ]

    # VMEM budget: everything stays resident (no grid, no per-step HBM traffic).
    operands = (x2,) + kparams
    resident = sum(int(a.size) * a.dtype.itemsize for a in operands)
    resident += 4 * T * B * (8 * H1 + 4 * H2 + 2 * H1) + 4 * B * O
    vmem_limit = int(min(96 * 2**20, max(16 * 2**20, 8 * resident)))

    return pl.pallas_call(
        _lstmnet_kernel,
        out_shape=jax.ShapeDtypeStruct((B, O), jnp.float32),
        in_specs=[vmem] * len(operands),
        out_specs=vmem,
        scratch_shapes=scratch_shapes,
        compiler_params=pltpu.CompilerParams(vmem_limit_bytes=vmem_limit),
    )(*operands)


# ----------------------------------------------------------------------------
# Deterministic parameter init (PyTorch-style uniform(-1/sqrt(H), 1/sqrt(H)))
# ----------------------------------------------------------------------------
def init_lstm_dir(key, in_dim, hidden):
    k1, k2, k3, k4 = jax.random.split(key, 4)
    s = 1.0 / np.sqrt(hidden)
    w_ih = jax.random.uniform(k1, (4 * hidden, in_dim), jnp.float32, -s, s)
    w_hh = jax.random.uniform(k2, (4 * hidden, hidden), jnp.float32, -s, s)
    b_ih = jax.random.uniform(k3, (4 * hidden,), jnp.float32, -s, s)
    b_hh = jax.random.uniform(k4, (4 * hidden,), jnp.float32, -s, s)
    return (w_ih.T, w_hh.T, (b_ih + b_hh).reshape(1, 4 * hidden))


def init_params(key, input_dim, hidden_dim, output_dim):
    H2, FC = 64, 32                       # fixed by the module: lstm2 hidden, fc1 out
    ks = jax.random.split(key, 7)
    s1 = 1.0 / np.sqrt(2 * H2)
    s2 = 1.0 / np.sqrt(FC)
    fc1_w = jax.random.uniform(ks[4], (FC, 2 * H2), jnp.float32, -s1, s1)
    fc1_b = jax.random.uniform(ks[5], (FC,), jnp.float32, -s1, s1)
    fc2_w = jax.random.uniform(ks[6], (output_dim, FC), jnp.float32, -s2, s2)
    return {
        "lstm1_f": init_lstm_dir(ks[0], input_dim, hidden_dim),
        "lstm1_b": init_lstm_dir(ks[1], input_dim, hidden_dim),
        "lstm2_f": init_lstm_dir(ks[2], 2 * hidden_dim, H2),
        "lstm2_b": init_lstm_dir(ks[3], 2 * hidden_dim, H2),
        "fc1_w_t": fc1_w.T,
        "fc1_b": fc1_b.reshape(1, FC),
        "fc2_w_t": fc2_w.T,
    }


# ----------------------------------------------------------------------------
# Pure-JAX f32 reference (lax.scan, full bi-LSTM both layers) for correctness
# ----------------------------------------------------------------------------
def ref_lstm_dir(x, w_ih_t, w_hh_t, bias):
    T, B, _ = x.shape
    H = w_hh_t.shape[0]

    def step(carry, xt):
        h, c = carry
        gates = xt @ w_ih_t + h @ w_hh_t + bias
        i = jax.nn.sigmoid(gates[:, :H])
        f = jax.nn.sigmoid(gates[:, H:2 * H])
        g = jnp.tanh(gates[:, 2 * H:3 * H])
        o = jax.nn.sigmoid(gates[:, 3 * H:])
        c = f * c + i * g
        h = o * jnp.tanh(c)
        return (h, c), h

    init = (jnp.zeros((B, H), jnp.float32), jnp.zeros((B, H), jnp.float32))
    _, ys = lax.scan(step, init, x)
    return ys


def ref_forward(x, p):
    def bi(xx, pf, pb):
        f = ref_lstm_dir(xx, *pf)
        b = ref_lstm_dir(xx[::-1], *pb)[::-1]
        return jnp.concatenate([f, b], axis=-1)

    fx = bi(x, p["lstm1_f"], p["lstm1_b"])
    fx = bi(fx, p["lstm2_f"], p["lstm2_b"])
    fx = fx[-1]
    h = jnp.tanh(fx @ p["fc1_w_t"] + p["fc1_b"])
    return h @ p["fc2_w_t"]


# ----------------------------------------------------------------------------
if __name__ == "__main__":
    T, B = 8, 8                                    # B=8 fills f32 vreg sublanes
    input_dim, hidden_dim, output_dim = 16, 32, 4  # small shapes for the test

    key = jax.random.PRNGKey(0)
    kx, kparam = jax.random.split(key)
    x = jax.random.normal(kx, (T, B, input_dim), jnp.float32)
    params = init_params(kparam, input_dim, hidden_dim, output_dim)

    out = jax.block_until_ready(lstmnet_forward(x, params))
    ref = jax.block_until_ready(ref_forward(x, params))

    assert out.shape == (B, output_dim), out.shape
    # Kernel uses bf16 MXU operands (f32 accumulation, f32 cell state) while
    # the reference is pure f32, so tolerances are loosened per the review.
    np.testing.assert_allclose(np.asarray(out), np.asarray(ref),
                               rtol=5e-2, atol=5e-2)
    print("KERNEL_OK")
</pallas_src>

<mosaic_0001>
module attributes {stable_mosaic.version = 11 : i64} {
  func.func @_lstmnet_kernel(%arg0: memref<64x32xbf16, #tpu.memory_space<vmem>>, %arg1: memref<32x256xbf16, #tpu.memory_space<vmem>>, %arg2: memref<1x256xf32, #tpu.memory_space<vmem>>, %arg3: memref<64x256xbf16, #tpu.memory_space<vmem>>, %arg4: memref<64x256xbf16, #tpu.memory_space<vmem>>, %arg5: memref<64x256xbf16, #tpu.memory_space<vmem>>, %arg6: memref<1x256xf32, #tpu.memory_space<vmem>>, %arg7: memref<64x256xbf16, #tpu.memory_space<vmem>>, %arg8: memref<1x256xf32, #tpu.memory_space<vmem>>, %arg9: memref<64x32xbf16, #tpu.memory_space<vmem>>, %arg10: memref<64x32xbf16, #tpu.memory_space<vmem>>, %arg11: memref<1x32xf32, #tpu.memory_space<vmem>>, %arg12: memref<32x4xbf16, #tpu.memory_space<vmem>>, %arg13: memref<8x4xf32, #tpu.memory_space<vmem>>, %arg14: memref<64x256xf32, #tpu.memory_space<vmem>>, %arg15: memref<64x256xf32, #tpu.memory_space<vmem>>, %arg16: memref<64x64xf32, #tpu.memory_space<vmem>>) attributes {dimension_semantics = [], scalar_prefetch = 0 : i64, scratch_operands = 3 : i64, tpu.core_type = #tpu.core_type<tc>} {
    %c0 = arith.constant 0 : index
    %c0_0 = arith.constant 0 : index
    %0 = vector.load %arg3[%c0, %c0_0] : memref<64x256xbf16, #tpu.memory_space<vmem>>, vector<64x256xbf16>
    %c0_1 = arith.constant 0 : index
    %c0_2 = arith.constant 0 : index
    %1 = vector.load %arg5[%c0_1, %c0_2] : memref<64x256xbf16, #tpu.memory_space<vmem>>, vector<64x256xbf16>
    %c0_3 = arith.constant 0 : index
    %c0_4 = arith.constant 0 : index
    %2 = vector.load %arg0[%c0_3, %c0_4] : memref<64x32xbf16, #tpu.memory_space<vmem>>, vector<64x32xbf16>
    %c0_5 = arith.constant 0 : index
    %c0_6 = arith.constant 0 : index
    %3 = vector.load %arg1[%c0_5, %c0_6] : memref<32x256xbf16, #tpu.memory_space<vmem>>, vector<32x256xbf16>
    %cst = arith.constant dense<0.000000e+00> : vector<64x256xf32>
    %4 = tpu.matmul %2, %3, %cst {dimension_numbers = #tpu.dot_dimension_numbers<[1], [0], [0], [1], [0, 0, 1, 1], [], []>} : vector<64x32xbf16>, vector<32x256xbf16>, vector<64x256xf32> -> vector<64x256xf32>
    %c0_7 = arith.constant 0 : index
    %c0_8 = arith.constant 0 : index
    %5 = vector.load %arg2[%c0_7, %c0_8] : memref<1x256xf32, #tpu.memory_space<vmem>>, vector<1x256xf32>
    %6 = vector.broadcast %5 : vector<1x256xf32> to vector<64x256xf32>
    %7 = arith.addf %4, %6 : vector<64x256xf32>
    %c0_9 = arith.constant 0 : index
    %c0_10 = arith.constant 0 : index
    %8 = vector.load %arg14[%c0_9, %c0_10] : memref<64x256xf32, #tpu.memory_space<vmem>>, vector<64x256xf32>
    tpu.vector_store %arg14[%c0_9, %c0_10], %7 {strides = array<i32>} : memref<64x256xf32, #tpu.memory_space<vmem>>, vector<64x256xf32>,
    %cst_11 = arith.constant 0.000000e+00 : f32
    %9 = vector.broadcast %cst_11 : f32 to vector<8x64xf32>
    %c0_i32 = arith.constant 0 : i32
    %c8_i32 = arith.constant 8 : i32
    %10 = arith.muli %c0_i32, %c8_i32 : i32
    %11 = tpu.assume_multiple %10, 8 : i32
    %12 = arith.index_cast %11 : i32 to index
    %c0_12 = arith.constant 0 : index
    %13 = vector.load %arg14[%12, %c0_12] : memref<64x256xf32, #tpu.memory_space<vmem>>, vector<8x256xf32>
    %14 = arith.truncf %9 : vector<8x64xf32> to vector<8x64xbf16>
    %cst_13 = arith.constant dense<0.000000e+00> : vector<8x256xf32>
    %15 = tpu.matmul %14, %0, %cst_13 {dimension_numbers = #tpu.dot_dimension_numbers<[1], [0], [0], [1], [0, 0, 1, 1], [], []>} : vector<8x64xbf16>, vector<64x256xbf16>, vector<8x256xf32> -> vector<8x256xf32>
    %16 = arith.addf %13, %15 : vector<8x256xf32>
    %17 = vector.extract_strided_slice %16 {offsets = [0, 0], sizes = [8, 192], strides = [1, 1]} : vector<8x256xf32> to vector<8x192xf32>
    %18 = arith.negf %17 : vector<8x192xf32>
    %19 = math.exp %18 : vector<8x192xf32>
    %cst_14 = arith.constant 1.000000e+00 : f32
    %20 = vector.broadcast %cst_14 : f32 to vector<8x192xf32>
    %21 = arith.addf %20, %19 : vector<8x192xf32>
    %22 = arith.divf %20, %21 : vector<8x192xf32>
    %23 = vector.extract_strided_slice %22 {offsets = [0, 0], sizes = [8, 64], strides = [1, 1]} : vector<8x192xf32> to vector<8x64xf32>
    %24 = vector.extract_strided_slice %22 {offsets = [0, 64], sizes = [8, 64], strides = [1, 1]} : vector<8x192xf32> to vector<8x64xf32>
    %25 = vector.extract_strided_slice %22 {offsets = [0, 128], sizes = [8, 64], strides = [1, 1]} : vector<8x192xf32> to vector<8x64xf32>
    %26 = vector.extract_strided_slice %16 {offsets = [0, 192], sizes = [8, 64], strides = [1, 1]} : vector<8x256xf32> to vector<8x64xf32>
    %27 = math.tanh %26 : vector<8x64xf32>
    %28 = arith.mulf %24, %9 : vector<8x64xf32>
    %29 = arith.mulf %23, %27 : vector<8x64xf32>
    %30 = arith.addf %28, %29 : vector<8x64xf32>
    %31 = math.tanh %30 : vector<8x64xf32>
    %32 = arith.mulf %25, %31 : vector<8x64xf32>
    %33 = vector.extract_strided_slice %32 {offsets = [0, 0], sizes = [8, 32], strides = [1, 1]} : vector<8x64xf32> to vector<8x32xf32>
    %c8_i32_15 = arith.constant 8 : i32
    %34 = arith.muli %c0_i32, %c8_i32_15 : i32
    %35 = tpu.assume_multiple %34, 8 : i32
    %36 = arith.index_cast %35 : i32 to index
    %c0_16 = arith.constant 0 : index
    %37 = vector.load %arg16[%36, %c0_16] : memref<64x64xf32, #tpu.memory_space<vmem>>, vector<8x32xf32>
    tpu.vector_store %arg16[%36, %c0_16], %33 {strides = array<i32>} : memref<64x64xf32, #tpu.memory_space<vmem>>, vector<8x32xf32>,
    %38 = vector.extract_strided_slice %32 {offsets = [0, 32], sizes = [8, 32], strides = [1, 1]} : vector<8x64xf32> to vector<8x32xf32>
    %c7_i32 = arith.constant 7 : i32
    %39 = arith.subi %c7_i32, %c0_i32 : i32
    %c8_i32_17 = arith.constant 8 : i32
    %40 = arith.muli %39, %c8_i32_17 : i32
    %41 = tpu.assume_multiple %40, 8 : i32
    %42 = arith.index_cast %41 : i32 to index
    %c32 = arith.constant 32 : index
    %43 = vector.load %arg16[%42, %c32] : memref<64x64xf32, #tpu.memory_space<vmem>>, vector<8x32xf32>
    tpu.vector_store %arg16[%42, %c32], %38 {strides = array<i32>} : memref<64x64xf32, #tpu.memory_space<vmem>>, vector<8x32xf32>,
    %c1_i32 = arith.constant 1 : i32
    %c8_i32_18 = arith.constant 8 : i32
    %44 = arith.muli %c1_i32, %c8_i32_18 : i32
    %45 = tpu.assume_multiple %44, 8 : i32
    %46 = arith.index_cast %45 : i32 to index
    %c0_19 = arith.constant 0 : index
    %47 = vector.load %arg14[%46, %c0_19] : memref<64x256xf32, #tpu.memory_space<vmem>>, vector<8x256xf32>
    %48 = arith.truncf %32 : vector<8x64xf32> to vector<8x64xbf16>
    %cst_20 = arith.constant dense<0.000000e+00> : vector<8x256xf32>
    %49 = tpu.matmul %48, %0, %cst_20 {dimension_numbers = #tpu.dot_dimension_numbers<[1], [0], [0], [1], [0, 0, 1, 1], [], []>} : vector<8x64xbf16>, vector<64x256xbf16>, vector<8x256xf32> -> vector<8x256xf32>
    %50 = arith.addf %47, %49 : vector<8x256xf32>
    %51 = vector.extract_strided_slice %50 {offsets = [0, 0], sizes = [8, 192], strides = [1, 1]} : vector<8x256xf32> to vector<8x192xf32>
    %52 = arith.negf %51 : vector<8x192xf32>
    %53 = math.exp %52 : vector<8x192xf32>
    %cst_21 = arith.constant 1.000000e+00 : f32
    %54 = vector.broadcast %cst_21 : f32 to vector<8x192xf32>
    %55 = arith.addf %54, %53 : vector<8x192xf32>
    %56 = arith.divf %54, %55 : vector<8x192xf32>
    %57 = vector.extract_strided_slice %56 {offsets = [0, 0], sizes = [8, 64], strides = [1, 1]} : vector<8x192xf32> to vector<8x64xf32>
    %58 = vector.extract_strided_slice %56 {offsets = [0, 64], sizes = [8, 64], strides = [1, 1]} : vector<8x192xf32> to vector<8x64xf32>
    %59 = vector.extract_strided_slice %56 {offsets = [0, 128], sizes = [8, 64], strides = [1, 1]} : vector<8x192xf32> to vector<8x64xf32>
    %60 = vector.extract_strided_slice %50 {offsets = [0, 192], sizes = [8, 64], strides = [1, 1]} : vector<8x256xf32> to vector<8x64xf32>
    %61 = math.tanh %60 : vector<8x64xf32>
    %62 = arith.mulf %58, %30 : vector<8x64xf32>
    %63 = arith.mulf %57, %61 : vector<8x64xf32>
    %64 = arith.addf %62, %63 : vector<8x64xf32>
    %65 = math.tanh %64 : vector<8x64xf32>
    %66 = arith.mulf %59, %65 : vector<8x64xf32>
    %67 = vector.extract_strided_slice %66 {offsets = [0, 0], sizes = [8, 32], strides = [1, 1]} : vector<8x64xf32> to vector<8x32xf32>
    %c8_i32_22 = arith.constant 8 : i32
    %68 = arith.muli %c1_i32, %c8_i32_22 : i32
    %69 = tpu.assume_multiple %68, 8 : i32
    %70 = arith.index_cast %69 : i32 to index
    %c0_23 = arith.constant 0 : index
    %71 = vector.load %arg16[%70, %c0_23] : memref<64x64xf32, #tpu.memory_space<vmem>>, vector<8x32xf32>
    tpu.vector_store %arg16[%70, %c0_23], %67 {strides = array<i32>} : memref<64x64xf32, #tpu.memory_space<vmem>>, vector<8x32xf32>,
    %72 = vector.extract_strided_slice %66 {offsets = [0, 32], sizes = [8, 32], strides = [1, 1]} : vector<8x64xf32> to vector<8x32xf32>
    %c7_i32_24 = arith.constant 7 : i32
    %73 = arith.subi %c7_i32_24, %c1_i32 : i32
    %c8_i32_25 = arith.constant 8 : i32
    %74 = arith.muli %73, %c8_i32_25 : i32
    %75 = tpu.assume_multiple %74, 8 : i32
    %76 = arith.index_cast %75 : i32 to index
    %c32_26 = arith.constant 32 : index
    %77 = vector.load %arg16[%76, %c32_26] : memref<64x64xf32, #tpu.memory_space<vmem>>, vector<8x32xf32>
    tpu.vector_store %arg16[%76, %c32_26], %72 {strides = array<i32>} : memref<64x64xf32, #tpu.memory_space<vmem>>, vector<8x32xf32>,
    %c2_i32 = arith.constant 2 : i32
    %c8_i32_27 = arith.constant 8 : i32
    %78 = arith.muli %c2_i32, %c8_i32_27 : i32
    %79 = tpu.assume_multiple %78, 8 : i32
    %80 = arith.index_cast %79 : i32 to index
    %c0_28 = arith.constant 0 : index
    %81 = vector.load %arg14[%80, %c0_28] : memref<64x256xf32, #tpu.memory_space<vmem>>, vector<8x256xf32>
    %82 = arith.truncf %66 : vector<8x64xf32> to vector<8x64xbf16>
    %cst_29 = arith.constant dense<0.000000e+00> : vector<8x256xf32>
    %83 = tpu.matmul %82, %0, %cst_29 {dimension_numbers = #tpu.dot_dimension_numbers<[1], [0], [0], [1], [0, 0, 1, 1], [], []>} : vector<8x64xbf16>, vector<64x256xbf16>, vector<8x256xf32> -> vector<8x256xf32>
    %84 = arith.addf %81, %83 : vector<8x256xf32>
    %85 = vector.extract_strided_slice %84 {offsets = [0, 0], sizes = [8, 192], strides = [1, 1]} : vector<8x256xf32> to vector<8x192xf32>
    %86 = arith.negf %85 : vector<8x192xf32>
    %87 = math.exp %86 : vector<8x192xf32>
    %cst_30 = arith.constant 1.000000e+00 : f32
    %88 = vector.broadcast %cst_30 : f32 to vector<8x192xf32>
    %89 = arith.addf %88, %87 : vector<8x192xf32>
    %90 = arith.divf %88, %89 : vector<8x192xf32>
    %91 = vector.extract_strided_slice %90 {offsets = [0, 0], sizes = [8, 64], strides = [1, 1]} : vector<8x192xf32> to vector<8x64xf32>
    %92 = vector.extract_strided_slice %90 {offsets = [0, 64], sizes = [8, 64], strides = [1, 1]} : vector<8x192xf32> to vector<8x64xf32>
    %93 = vector.extract_strided_slice %90 {offsets = [0, 128], sizes = [8, 64], strides = [1, 1]} : vector<8x192xf32> to vector<8x64xf32>
    %94 = vector.extract_strided_slice %84 {offsets = [0, 192], sizes = [8, 64], strides = [1, 1]} : vector<8x256xf32> to vector<8x64xf32>
    %95 = math.tanh %94 : vector<8x64xf32>
    %96 = arith.mulf %92, %64 : vector<8x64xf32>
    %97 = arith.mulf %91, %95 : vector<8x64xf32>
    %98 = arith.addf %96, %97 : vector<8x64xf32>
    %99 = math.tanh %98 : vector<8x64xf32>
    %100 = arith.mulf %93, %99 : vector<8x64xf32>
    %101 = vector.extract_strided_slice %100 {offsets = [0, 0], sizes = [8, 32], strides = [1, 1]} : vector<8x64xf32> to vector<8x32xf32>
    %c8_i32_31 = arith.constant 8 : i32
    %102 = arith.muli %c2_i32, %c8_i32_31 : i32
    %103 = tpu.assume_multiple %102, 8 : i32
    %104 = arith.index_cast %103 : i32 to index
    %c0_32 = arith.constant 0 : index
    %105 = vector.load %arg16[%104, %c0_32] : memref<64x64xf32, #tpu.memory_space<vmem>>, vector<8x32xf32>
    tpu.vector_store %arg16[%104, %c0_32], %101 {strides = array<i32>} : memref<64x64xf32, #tpu.memory_space<vmem>>, vector<8x32xf32>,
    %106 = vector.extract_strided_slice %100 {offsets = [0, 32], sizes = [8, 32], strides = [1, 1]} : vector<8x64xf32> to vector<8x32xf32>
    %c7_i32_33 = arith.constant 7 : i32
    %107 = arith.subi %c7_i32_33, %c2_i32 : i32
    %c8_i32_34 = arith.constant 8 : i32
    %108 = arith.muli %107, %c8_i32_34 : i32
    %109 = tpu.assume_multiple %108, 8 : i32
    %110 = arith.index_cast %109 : i32 to index
    %c32_35 = arith.constant 32 : index
    %111 = vector.load %arg16[%110, %c32_35] : memref<64x64xf32, #tpu.memory_space<vmem>>, vector<8x32xf32>
    tpu.vector_store %arg16[%110, %c32_35], %106 {strides = array<i32>} : memref<64x64xf32, #tpu.memory_space<vmem>>, vector<8x32xf32>,
    %c3_i32 = arith.constant 3 : i32
    %c8_i32_36 = arith.constant 8 : i32
    %112 = arith.muli %c3_i32, %c8_i32_36 : i32
    %113 = tpu.assume_multiple %112, 8 : i32
    %114 = arith.index_cast %113 : i32 to index
    %c0_37 = arith.constant 0 : index
    %115 = vector.load %arg14[%114, %c0_37] : memref<64x256xf32, #tpu.memory_space<vmem>>, vector<8x256xf32>
    %116 = arith.truncf %100 : vector<8x64xf32> to vector<8x64xbf16>
    %cst_38 = arith.constant dense<0.000000e+00> : vector<8x256xf32>
    %117 = tpu.matmul %116, %0, %cst_38 {dimension_numbers = #tpu.dot_dimension_numbers<[1], [0], [0], [1], [0, 0, 1, 1], [], []>} : vector<8x64xbf16>, vector<64x256xbf16>, vector<8x256xf32> -> vector<8x256xf32>
    %118 = arith.addf %115, %117 : vector<8x256xf32>
    %119 = vector.extract_strided_slice %118 {offsets = [0, 0], sizes = [8, 192], strides = [1, 1]} : vector<8x256xf32> to vector<8x192xf32>
    %120 = arith.negf %119 : vector<8x192xf32>
    %121 = math.exp %120 : vector<8x192xf32>
    %cst_39 = arith.constant 1.000000e+00 : f32
    %122 = vector.broadcast %cst_39 : f32 to vector<8x192xf32>
    %123 = arith.addf %122, %121 : vector<8x192xf32>
    %124 = arith.divf %122, %123 : vector<8x192xf32>
    %125 = vector.extract_strided_slice %124 {offsets = [0, 0], sizes = [8, 64], strides = [1, 1]} : vector<8x192xf32> to vector<8x64xf32>
    %126 = vector.extract_strided_slice %124 {offsets = [0, 64], sizes = [8, 64], strides = [1, 1]} : vector<8x192xf32> to vector<8x64xf32>
    %127 = vector.extract_strided_slice %124 {offsets = [0, 128], sizes = [8, 64], strides = [1, 1]} : vector<8x192xf32> to vector<8x64xf32>
    %128 = vector.extract_strided_slice %118 {offsets = [0, 192], sizes = [8, 64], strides = [1, 1]} : vector<8x256xf32> to vector<8x64xf32>
    %129 = math.tanh %128 : vector<8x64xf32>
    %130 = arith.mulf %126, %98 : vector<8x64xf32>
    %131 = arith.mulf %125, %129 : vector<8x64xf32>
    %132 = arith.addf %130, %131 : vector<8x64xf32>
    %133 = math.tanh %132 : vector<8x64xf32>
    %134 = arith.mulf %127, %133 : vector<8x64xf32>
    %135 = vector.extract_strided_slice %134 {offsets = [0, 0], sizes = [8, 32], strides = [1, 1]} : vector<8x64xf32> to vector<8x32xf32>
    %c8_i32_40 = arith.constant 8 : i32
    %136 = arith.muli %c3_i32, %c8_i32_40 : i32
    %137 = tpu.assume_multiple %136, 8 : i32
    %138 = arith.index_cast %137 : i32 to index
    %c0_41 = arith.constant 0 : index
    %139 = vector.load %arg16[%138, %c0_41] : memref<64x64xf32, #tpu.memory_space<vmem>>, vector<8x32xf32>
    tpu.vector_store %arg16[%138, %c0_41], %135 {strides = array<i32>} : memref<64x64xf32, #tpu.memory_space<vmem>>, vector<8x32xf32>,
    %140 = vector.extract_strided_slice %134 {offsets = [0, 32], sizes = [8, 32], strides = [1, 1]} : vector<8x64xf32> to vector<8x32xf32>
    %c7_i32_42 = arith.constant 7 : i32
    %141 = arith.subi %c7_i32_42, %c3_i32 : i32
    %c8_i32_43 = arith.constant 8 : i32
    %142 = arith.muli %141, %c8_i32_43 : i32
    %143 = tpu.assume_multiple %142, 8 : i32
    %144 = arith.index_cast %143 : i32 to index
    %c32_44 = arith.constant 32 : index
    %145 = vector.load %arg16[%144, %c32_44] : memref<64x64xf32, #tpu.memory_space<vmem>>, vector<8x32xf32>
    tpu.vector_store %arg16[%144, %c32_44], %140 {strides = array<i32>} : memref<64x64xf32, #tpu.memory_space<vmem>>, vector<8x32xf32>,
    %c4_i32 = arith.constant 4 : i32
    %c8_i32_45 = arith.constant 8 : i32
    %146 = arith.muli %c4_i32, %c8_i32_45 : i32
    %147 = tpu.assume_multiple %146, 8 : i32
    %148 = arith.index_cast %147 : i32 to index
    %c0_46 = arith.constant 0 : index
    %149 = vector.load %arg14[%148, %c0_46] : memref<64x256xf32, #tpu.memory_space<vmem>>, vector<8x256xf32>
    %150 = arith.truncf %134 : vector<8x64xf32> to vector<8x64xbf16>
    %cst_47 = arith.constant dense<0.000000e+00> : vector<8x256xf32>
    %151 = tpu.matmul %150, %0, %cst_47 {dimension_numbers = #tpu.dot_dimension_numbers<[1], [0], [0], [1], [0, 0, 1, 1], [], []>} : vector<8x64xbf16>, vector<64x256xbf16>, vector<8x256xf32> -> vector<8x256xf32>
    %152 = arith.addf %149, %151 : vector<8x256xf32>
    %153 = vector.extract_strided_slice %152 {offsets = [0, 0], sizes = [8, 192], strides = [1, 1]} : vector<8x256xf32> to vector<8x192xf32>
    %154 = arith.negf %153 : vector<8x192xf32>
    %155 = math.exp %154 : vector<8x192xf32>
    %cst_48 = arith.constant 1.000000e+00 : f32
    %156 = vector.broadcast %cst_48 : f32 to vector<8x192xf32>
    %157 = arith.addf %156, %155 : vector<8x192xf32>
    %158 = arith.divf %156, %157 : vector<8x192xf32>
    %159 = vector.extract_strided_slice %158 {offsets = [0, 0], sizes = [8, 64], strides = [1, 1]} : vector<8x192xf32> to vector<8x64xf32>
    %160 = vector.extract_strided_slice %158 {offsets = [0, 64], sizes = [8, 64], strides = [1, 1]} : vector<8x192xf32> to vector<8x64xf32>
    %161 = vector.extract_strided_slice %158 {offsets = [0, 128], sizes = [8, 64], strides = [1, 1]} : vector<8x192xf32> to vector<8x64xf32>
    %162 = vector.extract_strided_slice %152 {offsets = [0, 192], sizes = [8, 64], strides = [1, 1]} : vector<8x256xf32> to vector<8x64xf32>
    %163 = math.tanh %162 : vector<8x64xf32>
    %164 = arith.mulf %160, %132 : vector<8x64xf32>
    %165 = arith.mulf %159, %163 : vector<8x64xf32>
    %166 = arith.addf %164, %165 : vector<8x64xf32>
    %167 = math.tanh %166 : vector<8x64xf32>
    %168 = arith.mulf %161, %167 : vector<8x64xf32>
    %169 = vector.extract_strided_slice %168 {offsets = [0, 0], sizes = [8, 32], strides = [1, 1]} : vector<8x64xf32> to vector<8x32xf32>
    %c8_i32_49 = arith.constant 8 : i32
    %170 = arith.muli %c4_i32, %c8_i32_49 : i32
    %171 = tpu.assume_multiple %170, 8 : i32
    %172 = arith.index_cast %171 : i32 to index
    %c0_50 = arith.constant 0 : index
    %173 = vector.load %arg16[%172, %c0_50] : memref<64x64xf32, #tpu.memory_space<vmem>>, vector<8x32xf32>
    tpu.vector_store %arg16[%172, %c0_50], %169 {strides = array<i32>} : memref<64x64xf32, #tpu.memory_space<vmem>>, vector<8x32xf32>,
    %174 = vector.extract_strided_slice %168 {offsets = [0, 32], sizes = [8, 32], strides = [1, 1]} : vector<8x64xf32> to vector<8x32xf32>
    %c7_i32_51 = arith.constant 7 : i32
    %175 = arith.subi %c7_i32_51, %c4_i32 : i32
    %c8_i32_52 = arith.constant 8 : i32
    %176 = arith.muli %175, %c8_i32_52 : i32
    %177 = tpu.assume_multiple %176, 8 : i32
    %178 = arith.index_cast %177 : i32 to index
    %c32_53 = arith.constant 32 : index
    %179 = vector.load %arg16[%178, %c32_53] : memref<64x64xf32, #tpu.memory_space<vmem>>, vector<8x32xf32>
    tpu.vector_store %arg16[%178, %c32_53], %174 {strides = array<i32>} : memref<64x64xf32, #tpu.memory_space<vmem>>, vector<8x32xf32>,
    %c5_i32 = arith.constant 5 : i32
    %c8_i32_54 = arith.constant 8 : i32
    %180 = arith.muli %c5_i32, %c8_i32_54 : i32
    %181 = tpu.assume_multiple %180, 8 : i32
    %182 = arith.index_cast %181 : i32 to index
    %c0_55 = arith.constant 0 : index
    %183 = vector.load %arg14[%182, %c0_55] : memref<64x256xf32, #tpu.memory_space<vmem>>, vector<8x256xf32>
    %184 = arith.truncf %168 : vector<8x64xf32> to vector<8x64xbf16>
    %cst_56 = arith.constant dense<0.000000e+00> : vector<8x256xf32>
    %185 = tpu.matmul %184, %0, %cst_56 {dimension_numbers = #tpu.dot_dimension_numbers<[1], [0], [0], [1], [0, 0, 1, 1], [], []>} : vector<8x64xbf16>, vector<64x256xbf16>, vector<8x256xf32> -> vector<8x256xf32>
    %186 = arith.addf %183, %185 : vector<8x256xf32>
    %187 = vector.extract_strided_slice %186 {offsets = [0, 0], sizes = [8, 192], strides = [1, 1]} : vector<8x256xf32> to vector<8x192xf32>
    %188 = arith.negf %187 : vector<8x192xf32>
    %189 = math.exp %188 : vector<8x192xf32>
    %cst_57 = arith.constant 1.000000e+00 : f32
    %190 = vector.broadcast %cst_57 : f32 to vector<8x192xf32>
    %191 = arith.addf %190, %189 : vector<8x192xf32>
    %192 = arith.divf %190, %191 : vector<8x192xf32>
    %193 = vector.extract_strided_slice %192 {offsets = [0, 0], sizes = [8, 64], strides = [1, 1]} : vector<8x192xf32> to vector<8x64xf32>
    %194 = vector.extract_strided_slice %192 {offsets = [0, 64], sizes = [8, 64], strides = [1, 1]} : vector<8x192xf32> to vector<8x64xf32>
    %195 = vector.extract_strided_slice %192 {offsets = [0, 128], sizes = [8, 64], strides = [1, 1]} : vector<8x192xf32> to vector<8x64xf32>
    %196 = vector.extract_strided_slice %186 {offsets = [0, 192], sizes = [8, 64], strides = [1, 1]} : vector<8x256xf32> to vector<8x64xf32>
    %197 = math.tanh %196 : vector<8x64xf32>
    %198 = arith.mulf %194, %166 : vector<8x64xf32>
    %199 = arith.mulf %193, %197 : vector<8x64xf32>
    %200 = arith.addf %198, %199 : vector<8x64xf32>
    %201 = math.tanh %200 : vector<8x64xf32>
    %202 = arith.mulf %195, %201 : vector<8x64xf32>
    %203 = vector.extract_strided_slice %202 {offsets = [0, 0], sizes = [8, 32], strides = [1, 1]} : vector<8x64xf32> to vector<8x32xf32>
    %c8_i32_58 = arith.constant 8 : i32
    %204 = arith.muli %c5_i32, %c8_i32_58 : i32
    %205 = tpu.assume_multiple %204, 8 : i32
    %206 = arith.index_cast %205 : i32 to index
    %c0_59 = arith.constant 0 : index
    %207 = vector.load %arg16[%206, %c0_59] : memref<64x64xf32, #tpu.memory_space<vmem>>, vector<8x32xf32>
    tpu.vector_store %arg16[%206, %c0_59], %203 {strides = array<i32>} : memref<64x64xf32, #tpu.memory_space<vmem>>, vector<8x32xf32>,
    %208 = vector.extract_strided_slice %202 {offsets = [0, 32], sizes = [8, 32], strides = [1, 1]} : vector<8x64xf32> to vector<8x32xf32>
    %c7_i32_60 = arith.constant 7 : i32
    %209 = arith.subi %c7_i32_60, %c5_i32 : i32
    %c8_i32_61 = arith.constant 8 : i32
    %210 = arith.muli %209, %c8_i32_61 : i32
    %211 = tpu.assume_multiple %210, 8 : i32
    %212 = arith.index_cast %211 : i32 to index
    %c32_62 = arith.constant 32 : index
    %213 = vector.load %arg16[%212, %c32_62] : memref<64x64xf32, #tpu.memory_space<vmem>>, vector<8x32xf32>
    tpu.vector_store %arg16[%212, %c32_62], %208 {strides = array<i32>} : memref<64x64xf32, #tpu.memory_space<vmem>>, vector<8x32xf32>,
    %c6_i32 = arith.constant 6 : i32
    %c8_i32_63 = arith.constant 8 : i32
    %214 = arith.muli %c6_i32, %c8_i32_63 : i32
    %215 = tpu.assume_multiple %214, 8 : i32
    %216 = arith.index_cast %215 : i32 to index
    %c0_64 = arith.constant 0 : index
    %217 = vector.load %arg14[%216, %c0_64] : memref<64x256xf32, #tpu.memory_space<vmem>>, vector<8x256xf32>
    %218 = arith.truncf %202 : vector<8x64xf32> to vector<8x64xbf16>
    %cst_65 = arith.constant dense<0.000000e+00> : vector<8x256xf32>
    %219 = tpu.matmul %218, %0, %cst_65 {dimension_numbers = #tpu.dot_dimension_numbers<[1], [0], [0], [1], [0, 0, 1, 1], [], []>} : vector<8x64xbf16>, vector<64x256xbf16>, vector<8x256xf32> -> vector<8x256xf32>
    %220 = arith.addf %217, %219 : vector<8x256xf32>
    %221 = vector.extract_strided_slice %220 {offsets = [0, 0], sizes = [8, 192], strides = [1, 1]} : vector<8x256xf32> to vector<8x192xf32>
    %222 = arith.negf %221 : vector<8x192xf32>
    %223 = math.exp %222 : vector<8x192xf32>
    %cst_66 = arith.constant 1.000000e+00 : f32
    %224 = vector.broadcast %cst_66 : f32 to vector<8x192xf32>
    %225 = arith.addf %224, %223 : vector<8x192xf32>
    %226 = arith.divf %224, %225 : vector<8x192xf32>
    %227 = vector.extract_strided_slice %226 {offsets = [0, 0], sizes = [8, 64], strides = [1, 1]} : vector<8x192xf32> to vector<8x64xf32>
    %228 = vector.extract_strided_slice %226 {offsets = [0, 64], sizes = [8, 64], strides = [1, 1]} : vector<8x192xf32> to vector<8x64xf32>
    %229 = vector.extract_strided_slice %226 {offsets = [0, 128], sizes = [8, 64], strides = [1, 1]} : vector<8x192xf32> to vector<8x64xf32>
    %230 = vector.extract_strided_slice %220 {offsets = [0, 192], sizes = [8, 64], strides = [1, 1]} : vector<8x256xf32> to vector<8x64xf32>
    %231 = math.tanh %230 : vector<8x64xf32>
    %232 = arith.mulf %228, %200 : vector<8x64xf32>
    %233 = arith.mulf %227, %231 : vector<8x64xf32>
    %234 = arith.addf %232, %233 : vector<8x64xf32>
    %235 = math.tanh %234 : vector<8x64xf32>
    %236 = arith.mulf %229, %235 : vector<8x64xf32>
    %237 = vector.extract_strided_slice %236 {offsets = [0, 0], sizes = [8, 32], strides = [1, 1]} : vector<8x64xf32> to vector<8x32xf32>
    %c8_i32_67 = arith.constant 8 : i32
    %238 = arith.muli %c6_i32, %c8_i32_67 : i32
    %239 = tpu.assume_multiple %238, 8 : i32
    %240 = arith.index_cast %239 : i32 to index
    %c0_68 = arith.constant 0 : index
    %241 = vector.load %arg16[%240, %c0_68] : memref<64x64xf32, #tpu.memory_space<vmem>>, vector<8x32xf32>
    tpu.vector_store %arg16[%240, %c0_68], %237 {strides = array<i32>} : memref<64x64xf32, #tpu.memory_space<vmem>>, vector<8x32xf32>,
    %242 = vector.extract_strided_slice %236 {offsets = [0, 32], sizes = [8, 32], strides = [1, 1]} : vector<8x64xf32> to vector<8x32xf32>
    %c7_i32_69 = arith.constant 7 : i32
    %243 = arith.subi %c7_i32_69, %c6_i32 : i32
    %c8_i32_70 = arith.constant 8 : i32
    %244 = arith.muli %243, %c8_i32_70 : i32
    %245 = tpu.assume_multiple %244, 8 : i32
    %246 = arith.index_cast %245 : i32 to index
    %c32_71 = arith.constant 32 : index
    %247 = vector.load %arg16[%246, %c32_71] : memref<64x64xf32, #tpu.memory_space<vmem>>, vector<8x32xf32>
    tpu.vector_store %arg16[%246, %c32_71], %242 {strides = array<i32>} : memref<64x64xf32, #tpu.memory_space<vmem>>, vector<8x32xf32>,
    %c7_i32_72 = arith.constant 7 : i32
    %c8_i32_73 = arith.constant 8 : i32
    %248 = arith.muli %c7_i32_72, %c8_i32_73 : i32
    %249 = tpu.assume_multiple %248, 8 : i32
    %250 = arith.index_cast %249 : i32 to index
    %c0_74 = arith.constant 0 : index
    %251 = vector.load %arg14[%250, %c0_74] : memref<64x256xf32, #tpu.memory_space<vmem>>, vector<8x256xf32>
    %252 = arith.truncf %236 : vector<8x64xf32> to vector<8x64xbf16>
    %cst_75 = arith.constant dense<0.000000e+00> : vector<8x256xf32>
    %253 = tpu.matmul %252, %0, %cst_75 {dimension_numbers = #tpu.dot_dimension_numbers<[1], [0], [0], [1], [0, 0, 1, 1], [], []>} : vector<8x64xbf16>, vector<64x256xbf16>, vector<8x256xf32> -> vector<8x256xf32>
    %254 = arith.addf %251, %253 : vector<8x256xf32>
    %255 = vector.extract_strided_slice %254 {offsets = [0, 0], sizes = [8, 192], strides = [1, 1]} : vector<8x256xf32> to vector<8x192xf32>
    %256 = arith.negf %255 : vector<8x192xf32>
    %257 = math.exp %256 : vector<8x192xf32>
    %cst_76 = arith.constant 1.000000e+00 : f32
    %258 = vector.broadcast %cst_76 : f32 to vector<8x192xf32>
    %259 = arith.addf %258, %257 : vector<8x192xf32>
    %260 = arith.divf %258, %259 : vector<8x192xf32>
    %261 = vector.extract_strided_slice %260 {offsets = [0, 0], sizes = [8, 64], strides = [1, 1]} : vector<8x192xf32> to vector<8x64xf32>
    %262 = vector.extract_strided_slice %260 {offsets = [0, 64], sizes = [8, 64], strides = [1, 1]} : vector<8x192xf32> to vector<8x64xf32>
    %263 = vector.extract_strided_slice %260 {offsets = [0, 128], sizes = [8, 64], strides = [1, 1]} : vector<8x192xf32> to vector<8x64xf32>
    %264 = vector.extract_strided_slice %254 {offsets = [0, 192], sizes = [8, 64], strides = [1, 1]} : vector<8x256xf32> to vector<8x64xf32>
    %265 = math.tanh %264 : vector<8x64xf32>
    %266 = arith.mulf %262, %234 : vector<8x64xf32>
    %267 = arith.mulf %261, %265 : vector<8x64xf32>
    %268 = arith.addf %266, %267 : vector<8x64xf32>
    %269 = math.tanh %268 : vector<8x64xf32>
    %270 = arith.mulf %263, %269 : vector<8x64xf32>
    %271 = vector.extract_strided_slice %270 {offsets = [0, 0], sizes = [8, 32], strides = [1, 1]} : vector<8x64xf32> to vector<8x32xf32>
    %c8_i32_77 = arith.constant 8 : i32
    %272 = arith.muli %c7_i32_72, %c8_i32_77 : i32
    %273 = tpu.assume_multiple %272, 8 : i32
    %274 = arith.index_cast %273 : i32 to index
    %c0_78 = arith.constant 0 : index
    %275 = vector.load %arg16[%274, %c0_78] : memref<64x64xf32, #tpu.memory_space<vmem>>, vector<8x32xf32>
    tpu.vector_store %arg16[%274, %c0_78], %271 {strides = array<i32>} : memref<64x64xf32, #tpu.memory_space<vmem>>, vector<8x32xf32>,
    %276 = vector.extract_strided_slice %270 {offsets = [0, 32], sizes = [8, 32], strides = [1, 1]} : vector<8x64xf32> to vector<8x32xf32>
    %c7_i32_79 = arith.constant 7 : i32
    %277 = arith.subi %c7_i32_79, %c7_i32_72 : i32
    %c8_i32_80 = arith.constant 8 : i32
    %278 = arith.muli %277, %c8_i32_80 : i32
    %279 = tpu.assume_multiple %278, 8 : i32
    %280 = arith.index_cast %279 : i32 to index
    %c32_81 = arith.constant 32 : index
    %281 = vector.load %arg16[%280, %c32_81] : memref<64x64xf32, #tpu.memory_space<vmem>>, vector<8x32xf32>
    tpu.vector_store %arg16[%280, %c32_81], %276 {strides = array<i32>} : memref<64x64xf32, #tpu.memory_space<vmem>>, vector<8x32xf32>,
    %c8_i32_82 = arith.constant 8 : i32
    %c0_83 = arith.constant 0 : index
    %c0_84 = arith.constant 0 : index
    %282 = vector.load %arg16[%c0_83, %c0_84] : memref<64x64xf32, #tpu.memory_space<vmem>>, vector<64x64xf32>
    %283 = arith.truncf %282 : vector<64x64xf32> to vector<64x64xbf16>
    %c0_85 = arith.constant 0 : index
    %c0_86 = arith.constant 0 : index
    %284 = vector.load %arg4[%c0_85, %c0_86] : memref<64x256xbf16, #tpu.memory_space<vmem>>, vector<64x256xbf16>
    %cst_87 = arith.constant dense<0.000000e+00> : vector<64x256xf32>
    %285 = tpu.matmul %283, %284, %cst_87 {dimension_numbers = #tpu.dot_dimension_numbers<[1], [0], [0], [1], [0, 0, 1, 1], [], []>} : vector<64x64xbf16>, vector<64x256xbf16>, vector<64x256xf32> -> vector<64x256xf32>
    %c0_88 = arith.constant 0 : index
    %c0_89 = arith.constant 0 : index
    %286 = vector.load %arg6[%c0_88, %c0_89] : memref<1x256xf32, #tpu.memory_space<vmem>>, vector<1x256xf32>
    %287 = vector.broadcast %286 : vector<1x256xf32> to vector<64x256xf32>
    %288 = arith.addf %285, %287 : vector<64x256xf32>
    %c0_90 = arith.constant 0 : index
    %c0_91 = arith.constant 0 : index
    %289 = vector.load %arg15[%c0_90, %c0_91] : memref<64x256xf32, #tpu.memory_space<vmem>>, vector<64x256xf32>
    tpu.vector_store %arg15[%c0_90, %c0_91], %288 {strides = array<i32>} : memref<64x256xf32, #tpu.memory_space<vmem>>, vector<64x256xf32>,
    %cst_92 = arith.constant 0.000000e+00 : f32
    %290 = vector.broadcast %cst_92 : f32 to vector<8x64xf32>
    %c0_i32_93 = arith.constant 0 : i32
    %c8_i32_94 = arith.constant 8 : i32
    %291 = arith.muli %c0_i32_93, %c8_i32_94 : i32
    %292 = tpu.assume_multiple %291, 8 : i32
    %293 = arith.index_cast %292 : i32 to index
    %c0_95 = arith.constant 0 : index
    %294 = vector.load %arg15[%293, %c0_95] : memref<64x256xf32, #tpu.memory_space<vmem>>, vector<8x256xf32>
    %295 = arith.truncf %290 : vector<8x64xf32> to vector<8x64xbf16>
    %cst_96 = arith.constant dense<0.000000e+00> : vector<8x256xf32>
    %296 = tpu.matmul %295, %1, %cst_96 {dimension_numbers = #tpu.dot_dimension_numbers<[1], [0], [0], [1], [0, 0, 1, 1], [], []>} : vector<8x64xbf16>, vector<64x256xbf16>, vector<8x256xf32> -> vector<8x256xf32>
    %297 = arith.addf %294, %296 : vector<8x256xf32>
    %298 = vector.extract_strided_slice %297 {offsets = [0, 0], sizes = [8, 192], strides = [1, 1]} : vector<8x256xf32> to vector<8x192xf32>
    %299 = arith.negf %298 : vector<8x192xf32>
    %300 = math.exp %299 : vector<8x192xf32>
    %cst_97 = arith.constant 1.000000e+00 : f32
    %301 = vector.broadcast %cst_97 : f32 to vector<8x192xf32>
    %302 = arith.addf %301, %300 : vector<8x192xf32>
    %303 = arith.divf %301, %302 : vector<8x192xf32>
    %304 = vector.extract_strided_slice %303 {offsets = [0, 0], sizes = [8, 64], strides = [1, 1]} : vector<8x192xf32> to vector<8x64xf32>
    %305 = vector.extract_strided_slice %303 {offsets = [0, 64], sizes = [8, 64], strides = [1, 1]} : vector<8x192xf32> to vector<8x64xf32>
    %306 = vector.extract_strided_slice %303 {offsets = [0, 128], sizes = [8, 64], strides = [1, 1]} : vector<8x192xf32> to vector<8x64xf32>
    %307 = vector.extract_strided_slice %297 {offsets = [0, 192], sizes = [8, 64], strides = [1, 1]} : vector<8x256xf32> to vector<8x64xf32>
    %308 = math.tanh %307 : vector<8x64xf32>
    %309 = arith.mulf %305, %290 : vector<8x64xf32>
    %310 = arith.mulf %304, %308 : vector<8x64xf32>
    %311 = arith.addf %309, %310 : vector<8x64xf32>
    %312 = math.tanh %311 : vector<8x64xf32>
    %313 = arith.mulf %306, %312 : vector<8x64xf32>
    %c1_i32_98 = arith.constant 1 : i32
    %c8_i32_99 = arith.constant 8 : i32
    %314 = arith.muli %c1_i32_98, %c8_i32_99 : i32
    %315 = tpu.assume_multiple %314, 8 : i32
    %316 = arith.index_cast %315 : i32 to index
    %c0_100 = arith.constant 0 : index
    %317 = vector.load %arg15[%316, %c0_100] : memref<64x256xf32, #tpu.memory_space<vmem>>, vector<8x256xf32>
    %318 = arith.truncf %313 : vector<8x64xf32> to vector<8x64xbf16>
    %cst_101 = arith.constant dense<0.000000e+00> : vector<8x256xf32>
    %319 = tpu.matmul %318, %1, %cst_101 {dimension_numbers = #tpu.dot_dimension_numbers<[1], [0], [0], [1], [0, 0, 1, 1], [], []>} : vector<8x64xbf16>, vector<64x256xbf16>, vector<8x256xf32> -> vector<8x256xf32>
    %320 = arith.addf %317, %319 : vector<8x256xf32>
    %321 = vector.extract_strided_slice %320 {offsets = [0, 0], sizes = [8, 192], strides = [1, 1]} : vector<8x256xf32> to vector<8x192xf32>
    %322 = arith.negf %321 : vector<8x192xf32>
    %323 = math.exp %322 : vector<8x192xf32>
    %cst_102 = arith.constant 1.000000e+00 : f32
    %324 = vector.broadcast %cst_102 : f32 to vector<8x192xf32>
    %325 = arith.addf %324, %323 : vector<8x192xf32>
    %326 = arith.divf %324, %325 : vector<8x192xf32>
    %327 = vector.extract_strided_slice %326 {offsets = [0, 0], sizes = [8, 64], strides = [1, 1]} : vector<8x192xf32> to vector<8x64xf32>
    %328 = vector.extract_strided_slice %326 {offsets = [0, 64], sizes = [8, 64], strides = [1, 1]} : vector<8x192xf32> to vector<8x64xf32>
    %329 = vector.extract_strided_slice %326 {offsets = [0, 128], sizes = [8, 64], strides = [1, 1]} : vector<8x192xf32> to vector<8x64xf32>
    %330 = vector.extract_strided_slice %320 {offsets = [0, 192], sizes = [8, 64], strides = [1, 1]} : vector<8x256xf32> to vector<8x64xf32>
    %331 = math.tanh %330 : vector<8x64xf32>
    %332 = arith.mulf %328, %311 : vector<8x64xf32>
    %333 = arith.mulf %327, %331 : vector<8x64xf32>
    %334 = arith.addf %332, %333 : vector<8x64xf32>
    %335 = math.tanh %334 : vector<8x64xf32>
    %336 = arith.mulf %329, %335 : vector<8x64xf32>
    %c2_i32_103 = arith.constant 2 : i32
    %c8_i32_104 = arith.constant 8 : i32
    %337 = arith.muli %c2_i32_103, %c8_i32_104 : i32
    %338 = tpu.assume_multiple %337, 8 : i32
    %339 = arith.index_cast %338 : i32 to index
    %c0_105 = arith.constant 0 : index
    %340 = vector.load %arg15[%339, %c0_105] : memref<64x256xf32, #tpu.memory_space<vmem>>, vector<8x256xf32>
    %341 = arith.truncf %336 : vector<8x64xf32> to vector<8x64xbf16>
    %cst_106 = arith.constant dense<0.000000e+00> : vector<8x256xf32>
    %342 = tpu.matmul %341, %1, %cst_106 {dimension_numbers = #tpu.dot_dimension_numbers<[1], [0], [0], [1], [0, 0, 1, 1], [], []>} : vector<8x64xbf16>, vector<64x256xbf16>, vector<8x256xf32> -> vector<8x256xf32>
    %343 = arith.addf %340, %342 : vector<8x256xf32>
    %344 = vector.extract_strided_slice %343 {offsets = [0, 0], sizes = [8, 192], strides = [1, 1]} : vector<8x256xf32> to vector<8x192xf32>
    %345 = arith.negf %344 : vector<8x192xf32>
    %346 = math.exp %345 : vector<8x192xf32>
    %cst_107 = arith.constant 1.000000e+00 : f32
    %347 = vector.broadcast %cst_107 : f32 to vector<8x192xf32>
    %348 = arith.addf %347, %346 : vector<8x192xf32>
    %349 = arith.divf %347, %348 : vector<8x192xf32>
    %350 = vector.extract_strided_slice %349 {offsets = [0, 0], sizes = [8, 64], strides = [1, 1]} : vector<8x192xf32> to vector<8x64xf32>
    %351 = vector.extract_strided_slice %349 {offsets = [0, 64], sizes = [8, 64], strides = [1, 1]} : vector<8x192xf32> to vector<8x64xf32>
    %352 = vector.extract_strided_slice %349 {offsets = [0, 128], sizes = [8, 64], strides = [1, 1]} : vector<8x192xf32> to vector<8x64xf32>
    %353 = vector.extract_strided_slice %343 {offsets = [0, 192], sizes = [8, 64], strides = [1, 1]} : vector<8x256xf32> to vector<8x64xf32>
    %354 = math.tanh %353 : vector<8x64xf32>
    %355 = arith.mulf %351, %334 : vector<8x64xf32>
    %356 = arith.mulf %350, %354 : vector<8x64xf32>
    %357 = arith.addf %355, %356 : vector<8x64xf32>
    %358 = math.tanh %357 : vector<8x64xf32>
    %359 = arith.mulf %352, %358 : vector<8x64xf32>
    %c3_i32_108 = arith.constant 3 : i32
    %c8_i32_109 = arith.constant 8 : i32
    %360 = arith.muli %c3_i32_108, %c8_i32_109 : i32
    %361 = tpu.assume_multiple %360, 8 : i32
    %362 = arith.index_cast %361 : i32 to index
    %c0_110 = arith.constant 0 : index
    %363 = vector.load %arg15[%362, %c0_110] : memref<64x256xf32, #tpu.memory_space<vmem>>, vector<8x256xf32>
    %364 = arith.truncf %359 : vector<8x64xf32> to vector<8x64xbf16>
    %cst_111 = arith.constant dense<0.000000e+00> : vector<8x256xf32>
    %365 = tpu.matmul %364, %1, %cst_111 {dimension_numbers = #tpu.dot_dimension_numbers<[1], [0], [0], [1], [0, 0, 1, 1], [], []>} : vector<8x64xbf16>, vector<64x256xbf16>, vector<8x256xf32> -> vector<8x256xf32>
    %366 = arith.addf %363, %365 : vector<8x256xf32>
    %367 = vector.extract_strided_slice %366 {offsets = [0, 0], sizes = [8, 192], strides = [1, 1]} : vector<8x256xf32> to vector<8x192xf32>
    %368 = arith.negf %367 : vector<8x192xf32>
    %369 = math.exp %368 : vector<8x192xf32>
    %cst_112 = arith.constant 1.000000e+00 : f32
    %370 = vector.broadcast %cst_112 : f32 to vector<8x192xf32>
    %371 = arith.addf %370, %369 : vector<8x192xf32>
    %372 = arith.divf %370, %371 : vector<8x192xf32>
    %373 = vector.extract_strided_slice %372 {offsets = [0, 0], sizes = [8, 64], strides = [1, 1]} : vector<8x192xf32> to vector<8x64xf32>
    %374 = vector.extract_strided_slice %372 {offsets = [0, 64], sizes = [8, 64], strides = [1, 1]} : vector<8x192xf32> to vector<8x64xf32>
    %375 = vector.extract_strided_slice %372 {offsets = [0, 128], sizes = [8, 64], strides = [1, 1]} : vector<8x192xf32> to vector<8x64xf32>
    %376 = vector.extract_strided_slice %366 {offsets = [0, 192], sizes = [8, 64], strides = [1, 1]} : vector<8x256xf32> to vector<8x64xf32>
    %377 = math.tanh %376 : vector<8x64xf32>
    %378 = arith.mulf %374, %357 : vector<8x64xf32>
    %379 = arith.mulf %373, %377 : vector<8x64xf32>
    %380 = arith.addf %378, %379 : vector<8x64xf32>
    %381 = math.tanh %380 : vector<8x64xf32>
    %382 = arith.mulf %375, %381 : vector<8x64xf32>
    %c4_i32_113 = arith.constant 4 : i32
    %c8_i32_114 = arith.constant 8 : i32
    %383 = arith.muli %c4_i32_113, %c8_i32_114 : i32
    %384 = tpu.assume_multiple %383, 8 : i32
    %385 = arith.index_cast %384 : i32 to index
    %c0_115 = arith.constant 0 : index
    %386 = vector.load %arg15[%385, %c0_115] : memref<64x256xf32, #tpu.memory_space<vmem>>, vector<8x256xf32>
    %387 = arith.truncf %382 : vector<8x64xf32> to vector<8x64xbf16>
    %cst_116 = arith.constant dense<0.000000e+00> : vector<8x256xf32>
    %388 = tpu.matmul %387, %1, %cst_116 {dimension_numbers = #tpu.dot_dimension_numbers<[1], [0], [0], [1], [0, 0, 1, 1], [], []>} : vector<8x64xbf16>, vector<64x256xbf16>, vector<8x256xf32> -> vector<8x256xf32>
    %389 = arith.addf %386, %388 : vector<8x256xf32>
    %390 = vector.extract_strided_slice %389 {offsets = [0, 0], sizes = [8, 192], strides = [1, 1]} : vector<8x256xf32> to vector<8x192xf32>
    %391 = arith.negf %390 : vector<8x192xf32>
    %392 = math.exp %391 : vector<8x192xf32>
    %cst_117 = arith.constant 1.000000e+00 : f32
    %393 = vector.broadcast %cst_117 : f32 to vector<8x192xf32>
    %394 = arith.addf %393, %392 : vector<8x192xf32>
    %395 = arith.divf %393, %394 : vector<8x192xf32>
    %396 = vector.extract_strided_slice %395 {offsets = [0, 0], sizes = [8, 64], strides = [1, 1]} : vector<8x192xf32> to vector<8x64xf32>
    %397 = vector.extract_strided_slice %395 {offsets = [0, 64], sizes = [8, 64], strides = [1, 1]} : vector<8x192xf32> to vector<8x64xf32>
    %398 = vector.extract_strided_slice %395 {offsets = [0, 128], sizes = [8, 64], strides = [1, 1]} : vector<8x192xf32> to vector<8x64xf32>
    %399 = vector.extract_strided_slice %389 {offsets = [0, 192], sizes = [8, 64], strides = [1, 1]} : vector<8x256xf32> to vector<8x64xf32>
    %400 = math.tanh %399 : vector<8x64xf32>
    %401 = arith.mulf %397, %380 : vector<8x64xf32>
    %402 = arith.mulf %396, %400 : vector<8x64xf32>
    %403 = arith.addf %401, %402 : vector<8x64xf32>
    %404 = math.tanh %403 : vector<8x64xf32>
    %405 = arith.mulf %398, %404 : vector<8x64xf32>
    %c5_i32_118 = arith.constant 5 : i32
    %c8_i32_119 = arith.constant 8 : i32
    %406 = arith.muli %c5_i32_118, %c8_i32_119 : i32
    %407 = tpu.assume_multiple %406, 8 : i32
    %408 = arith.index_cast %407 : i32 to index
    %c0_120 = arith.constant 0 : index
    %409 = vector.load %arg15[%408, %c0_120] : memref<64x256xf32, #tpu.memory_space<vmem>>, vector<8x256xf32>
    %410 = arith.truncf %405 : vector<8x64xf32> to vector<8x64xbf16>
    %cst_121 = arith.constant dense<0.000000e+00> : vector<8x256xf32>
    %411 = tpu.matmul %410, %1, %cst_121 {dimension_numbers = #tpu.dot_dimension_numbers<[1], [0], [0], [1], [0, 0, 1, 1], [], []>} : vector<8x64xbf16>, vector<64x256xbf16>, vector<8x256xf32> -> vector<8x256xf32>
    %412 = arith.addf %409, %411 : vector<8x256xf32>
    %413 = vector.extract_strided_slice %412 {offsets = [0, 0], sizes = [8, 192], strides = [1, 1]} : vector<8x256xf32> to vector<8x192xf32>
    %414 = arith.negf %413 : vector<8x192xf32>
    %415 = math.exp %414 : vector<8x192xf32>
    %cst_122 = arith.constant 1.000000e+00 : f32
    %416 = vector.broadcast %cst_122 : f32 to vector<8x192xf32>
    %417 = arith.addf %416, %415 : vector<8x192xf32>
    %418 = arith.divf %416, %417 : vector<8x192xf32>
    %419 = vector.extract_strided_slice %418 {offsets = [0, 0], sizes = [8, 64], strides = [1, 1]} : vector<8x192xf32> to vector<8x64xf32>
    %420 = vector.extract_strided_slice %418 {offsets = [0, 64], sizes = [8, 64], strides = [1, 1]} : vector<8x192xf32> to vector<8x64xf32>
    %421 = vector.extract_strided_slice %418 {offsets = [0, 128], sizes = [8, 64], strides = [1, 1]} : vector<8x192xf32> to vector<8x64xf32>
    %422 = vector.extract_strided_slice %412 {offsets = [0, 192], sizes = [8, 64], strides = [1, 1]} : vector<8x256xf32> to vector<8x64xf32>
    %423 = math.tanh %422 : vector<8x64xf32>
    %424 = arith.mulf %420, %403 : vector<8x64xf32>
    %425 = arith.mulf %419, %423 : vector<8x64xf32>
    %426 = arith.addf %424, %425 : vector<8x64xf32>
    %427 = math.tanh %426 : vector<8x64xf32>
    %428 = arith.mulf %421, %427 : vector<8x64xf32>
    %c6_i32_123 = arith.constant 6 : i32
    %c8_i32_124 = arith.constant 8 : i32
    %429 = arith.muli %c6_i32_123, %c8_i32_124 : i32
    %430 = tpu.assume_multiple %429, 8 : i32
    %431 = arith.index_cast %430 : i32 to index
    %c0_125 = arith.constant 0 : index
    %432 = vector.load %arg15[%431, %c0_125] : memref<64x256xf32, #tpu.memory_space<vmem>>, vector<8x256xf32>
    %433 = arith.truncf %428 : vector<8x64xf32> to vector<8x64xbf16>
    %cst_126 = arith.constant dense<0.000000e+00> : vector<8x256xf32>
    %434 = tpu.matmul %433, %1, %cst_126 {dimension_numbers = #tpu.dot_dimension_numbers<[1], [0], [0], [1], [0, 0, 1, 1], [], []>} : vector<8x64xbf16>, vector<64x256xbf16>, vector<8x256xf32> -> vector<8x256xf32>
    %435 = arith.addf %432, %434 : vector<8x256xf32>
    %436 = vector.extract_strided_slice %435 {offsets = [0, 0], sizes = [8, 192], strides = [1, 1]} : vector<8x256xf32> to vector<8x192xf32>
    %437 = arith.negf %436 : vector<8x192xf32>
    %438 = math.exp %437 : vector<8x192xf32>
    %cst_127 = arith.constant 1.000000e+00 : f32
    %439 = vector.broadcast %cst_127 : f32 to vector<8x192xf32>
    %440 = arith.addf %439, %438 : vector<8x192xf32>
    %441 = arith.divf %439, %440 : vector<8x192xf32>
    %442 = vector.extract_strided_slice %441 {offsets = [0, 0], sizes = [8, 64], strides = [1, 1]} : vector<8x192xf32> to vector<8x64xf32>
    %443 = vector.extract_strided_slice %441 {offsets = [0, 64], sizes = [8, 64], strides = [1, 1]} : vector<8x192xf32> to vector<8x64xf32>
    %444 = vector.extract_strided_slice %441 {offsets = [0, 128], sizes = [8, 64], strides = [1, 1]} : vector<8x192xf32> to vector<8x64xf32>
    %445 = vector.extract_strided_slice %435 {offsets = [0, 192], sizes = [8, 64], strides = [1, 1]} : vector<8x256xf32> to vector<8x64xf32>
    %446 = math.tanh %445 : vector<8x64xf32>
    %447 = arith.mulf %443, %426 : vector<8x64xf32>
    %448 = arith.mulf %442, %446 : vector<8x64xf32>
    %449 = arith.addf %447, %448 : vector<8x64xf32>
    %450 = math.tanh %449 : vector<8x64xf32>
    %451 = arith.mulf %444, %450 : vector<8x64xf32>
    %c7_i32_128 = arith.constant 7 : i32
    %c8_i32_129 = arith.constant 8 : i32
    %452 = arith.muli %c7_i32_128, %c8_i32_129 : i32
    %453 = tpu.assume_multiple %452, 8 : i32
    %454 = arith.index_cast %453 : i32 to index
    %c0_130 = arith.constant 0 : index
    %455 = vector.load %arg15[%454, %c0_130] : memref<64x256xf32, #tpu.memory_space<vmem>>, vector<8x256xf32>
    %456 = arith.truncf %451 : vector<8x64xf32> to vector<8x64xbf16>
    %cst_131 = arith.constant dense<0.000000e+00> : vector<8x256xf32>
    %457 = tpu.matmul %456, %1, %cst_131 {dimension_numbers = #tpu.dot_dimension_numbers<[1], [0], [0], [1], [0, 0, 1, 1], [], []>} : vector<8x64xbf16>, vector<64x256xbf16>, vector<8x256xf32> -> vector<8x256xf32>
    %458 = arith.addf %455, %457 : vector<8x256xf32>
    %459 = vector.extract_strided_slice %458 {offsets = [0, 0], sizes = [8, 192], strides = [1, 1]} : vector<8x256xf32> to vector<8x192xf32>
    %460 = arith.negf %459 : vector<8x192xf32>
    %461 = math.exp %460 : vector<8x192xf32>
    %cst_132 = arith.constant 1.000000e+00 : f32
    %462 = vector.broadcast %cst_132 : f32 to vector<8x192xf32>
    %463 = arith.addf %462, %461 : vector<8x192xf32>
    %464 = arith.divf %462, %463 : vector<8x192xf32>
    %465 = vector.extract_strided_slice %464 {offsets = [0, 0], sizes = [8, 64], strides = [1, 1]} : vector<8x192xf32> to vector<8x64xf32>
    %466 = vector.extract_strided_slice %464 {offsets = [0, 64], sizes = [8, 64], strides = [1, 1]} : vector<8x192xf32> to vector<8x64xf32>
    %467 = vector.extract_strided_slice %464 {offsets = [0, 128], sizes = [8, 64], strides = [1, 1]} : vector<8x192xf32> to vector<8x64xf32>
    %468 = vector.extract_strided_slice %458 {offsets = [0, 192], sizes = [8, 64], strides = [1, 1]} : vector<8x256xf32> to vector<8x64xf32>
    %469 = math.tanh %468 : vector<8x64xf32>
    %470 = arith.mulf %466, %449 : vector<8x64xf32>
    %471 = arith.mulf %465, %469 : vector<8x64xf32>
    %472 = arith.addf %470, %471 : vector<8x64xf32>
    %473 = math.tanh %472 : vector<8x64xf32>
    %474 = arith.mulf %467, %473 : vector<8x64xf32>
    %c8_i32_133 = arith.constant 8 : i32
    %c56_i32 = arith.constant 56 : i32
    %475 = tpu.assume_multiple %c56_i32, 8 : i32
    %476 = arith.index_cast %475 : i32 to index
    %c0_134 = arith.constant 0 : index
    %477 = vector.load %arg16[%476, %c0_134] : memref<64x64xf32, #tpu.memory_space<vmem>>, vector<8x64xf32>
    %478 = arith.truncf %477 : vector<8x64xf32> to vector<8x64xbf16>
    %c0_135 = arith.constant 0 : index
    %c0_136 = arith.constant 0 : index
    %479 = vector.load %arg7[%c0_135, %c0_136] : memref<64x256xbf16, #tpu.memory_space<vmem>>, vector<64x256xbf16>
    %cst_137 = arith.constant dense<0.000000e+00> : vector<8x256xf32>
    %480 = tpu.matmul %478, %479, %cst_137 {dimension_numbers = #tpu.dot_dimension_numbers<[1], [0], [0], [1], [0, 0, 1, 1], [], []>} : vector<8x64xbf16>, vector<64x256xbf16>, vector<8x256xf32> -> vector<8x256xf32>
    %c0_138 = arith.constant 0 : index
    %c0_139 = arith.constant 0 : index
    %481 = vector.load %arg8[%c0_138, %c0_139] : memref<1x256xf32, #tpu.memory_space<vmem>>, vector<1x256xf32>
    %482 = vector.broadcast %481 : vector<1x256xf32> to vector<8x256xf32>
    %483 = arith.addf %480, %482 : vector<8x256xf32>
    %484 = vector.extract_strided_slice %483 {offsets = [0, 0], sizes = [8, 192], strides = [1, 1]} : vector<8x256xf32> to vector<8x192xf32>
    %485 = arith.negf %484 : vector<8x192xf32>
    %486 = math.exp %485 : vector<8x192xf32>
    %cst_140 = arith.constant 1.000000e+00 : f32
    %487 = vector.broadcast %cst_140 : f32 to vector<8x192xf32>
    %488 = arith.addf %487, %486 : vector<8x192xf32>
    %489 = arith.divf %487, %488 : vector<8x192xf32>
    %490 = vector.extract_strided_slice %489 {offsets = [0, 0], sizes = [8, 64], strides = [1, 1]} : vector<8x192xf32> to vector<8x64xf32>
    %491 = vector.extract_strided_slice %489 {offsets = [0, 64], sizes = [8, 64], strides = [1, 1]} : vector<8x192xf32> to vector<8x64xf32>
    %492 = vector.extract_strided_slice %489 {offsets = [0, 128], sizes = [8, 64], strides = [1, 1]} : vector<8x192xf32> to vector<8x64xf32>
    %493 = vector.extract_strided_slice %483 {offsets = [0, 192], sizes = [8, 64], strides = [1, 1]} : vector<8x256xf32> to vector<8x64xf32>
    %494 = math.tanh %493 : vector<8x64xf32>
    %495 = arith.mulf %491, %290 : vector<8x64xf32>
    %496 = arith.mulf %490, %494 : vector<8x64xf32>
    %497 = arith.addf %495, %496 : vector<8x64xf32>
    %498 = math.tanh %497 : vector<8x64xf32>
    %499 = arith.mulf %492, %498 : vector<8x64xf32>
    %500 = arith.truncf %474 : vector<8x64xf32> to vector<8x64xbf16>
    %c0_141 = arith.constant 0 : index
    %c0_142 = arith.constant 0 : index
    %501 = vector.load %arg9[%c0_141, %c0_142] : memref<64x32xbf16, #tpu.memory_space<vmem>>, vector<64x32xbf16>
    %cst_143 = arith.constant dense<0.000000e+00> : vector<8x32xf32>
    %502 = tpu.matmul %500, %501, %cst_143 {dimension_numbers = #tpu.dot_dimension_numbers<[1], [0], [0], [1], [0, 0, 1, 1], [], []>} : vector<8x64xbf16>, vector<64x32xbf16>, vector<8x32xf32> -> vector<8x32xf32>
    %503 = arith.truncf %499 : vector<8x64xf32> to vector<8x64xbf16>
    %c0_144 = arith.constant 0 : index
    %c0_145 = arith.constant 0 : index
    %504 = vector.load %arg10[%c0_144, %c0_145] : memref<64x32xbf16, #tpu.memory_space<vmem>>, vector<64x32xbf16>
    %cst_146 = arith.constant dense<0.000000e+00> : vector<8x32xf32>
    %505 = tpu.matmul %503, %504, %cst_146 {dimension_numbers = #tpu.dot_dimension_numbers<[1], [0], [0], [1], [0, 0, 1, 1], [], []>} : vector<8x64xbf16>, vector<64x32xbf16>, vector<8x32xf32> -> vector<8x32xf32>
    %506 = arith.addf %502, %505 : vector<8x32xf32>
    %c0_147 = arith.constant 0 : index
    %c0_148 = arith.constant 0 : index
    %507 = vector.load %arg11[%c0_147, %c0_148] : memref<1x32xf32, #tpu.memory_space<vmem>>, vector<1x32xf32>
    %508 = vector.broadcast %507 : vector<1x32xf32> to vector<8x32xf32>
    %509 = arith.addf %506, %508 : vector<8x32xf32>
    %510 = math.tanh %509 : vector<8x32xf32>
    %511 = arith.truncf %510 : vector<8x32xf32> to vector<8x32xbf16>
    %c0_149 = arith.constant 0 : index
    %c0_150 = arith.constant 0 : index
    %512 = vector.load %arg12[%c0_149, %c0_150] : memref<32x4xbf16, #tpu.memory_space<vmem>>, vector<32x4xbf16>
    %cst_151 = arith.constant dense<0.000000e+00> : vector<8x4xf32>
    %513 = tpu.matmul %511, %512, %cst_151 {dimension_numbers = #tpu.dot_dimension_numbers<[1], [0], [0], [1], [0, 0, 1, 1], [], []>} : vector<8x32xbf16>, vector<32x4xbf16>, vector<8x4xf32> -> vector<8x4xf32>
    %c0_152 = arith.constant 0 : index
    %c0_153 = arith.constant 0 : index
    %514 = vector.load %arg13[%c0_152, %c0_153] : memref<8x4xf32, #tpu.memory_space<vmem>>, vector<8x4xf32>
    tpu.vector_store %arg13[%c0_152, %c0_153], %513 {strides = array<i32>} : memref<8x4xf32, #tpu.memory_space<vmem>>, vector<8x4xf32>,
    return
  }
}

</mosaic_0001>

<bundles_post_ra>
// kernel: tpu_custom_call.1
= control target key start
LH: loop header
LB: loop body
LE: loop exit
PB: predicated region body
PF: predicated region fallthrough
CT: control target
= control target key end

     0   :  { %18 = vsyncpa [#allocation6], 0  ;;  %s3409_s0 = inlined_call_operand.vmem [shape: bf16[64,32], index: 0, kind: input, shape index: {}]   ;;  %s3410_s1 = inlined_call_operand.vmem [shape: bf16[32,256], index: 1, kind: input, shape index: {}]   ;;  %s3411_s2 = inlined_call_operand.hbm [shape: f32[1,256], index: 2, kind: input, shape index: {}]   ;;  %s3412_s3 = inlined_call_operand.vmem [shape: bf16[64,256], index: 3, kind: input, shape index: {}]   ;;  %s3413_s4 = inlined_call_operand.vmem [shape: bf16[64,256], index: 4, kind: input, shape index: {}]   ;;  %s3414_s5 = inlined_call_operand.hbm [shape: bf16[64,256], index: 5, kind: input, shape index: {}]   ;;  %s3415_s6 = inlined_call_operand.hbm [shape: f32[1,256], index: 6, kind: input, shape index: {}]   ;;  %s3416_s7 = inlined_call_operand.hbm [shape: bf16[64,256], index: 7, kind: input, shape index: {}]   ;;  %s3417_s8 = inlined_call_operand.hbm [shape: f32[1,256], index: 8, kind: input, shape index: {}]   ;;  %s3418_s9 = inlined_call_operand.vmem [shape: bf16[64,32], index: 9, kind: input, shape index: {}]   ;;  %s3419_s10 = inlined_call_operand.vmem [shape: bf16[64,32], index: 10, kind: input, shape index: {}]   ;;  %s3420_s11 = inlined_call_operand.vmem [shape: f32[1,32], index: 11, kind: input, shape index: {}]   ;;  %s3421_s12 = inlined_call_operand.vmem [shape: bf16[32,4], index: 12, kind: input, shape index: {}]   ;;  %s3422_s13 = inlined_call_operand.vmem [shape: f32[8,4], index: 13, kind: output, shape index: {}]  }
   0x1   :  { %19 = vsyncpa [#allocation8], 0 }
   0x2   :  { %20 = vsyncpa [#allocation11], 0  ;;  %s2793_s25 = smov [#allocation7]  }
   0x3   :  { %s44_s26 = sshll.u32 %s2793_s25, 4  ;;  %s45_s26 = int_to_ptr.vmem [resolvable:$true] %s44_s26 }
   0x4   :  { %s2695_s27 = scalar_lea.vmem %s45_s26, 1024  ;;  %p2700_p1 = scmp.lt.s32.totalorder %s45_s26, %s45_s26 }
   0x5   :  { %p2696_p0 = scmp.ne.s32.totalorder %s45_s26, %s2695_s27  ;;  %p2701_p2 = scmp.lt.s32.totalorder %s2695_s27, %s2695_s27 }
   0x7   :  { %p2702_p3 = por %p2701_p2, %p2700_p1 }
   0x9   :  { %p2703_p4 = pnand %p2702_p3, %p2696_p0 }
   0xb   :  { %2706 = shalt.err (!%p2703_p4)
}
   0xc   :  { %s2794_s28 = smov 128   ;;  %s2795_s29 = smov 8  }
   0xd   :  { %50 = dma.hbm_to_vmem [thread:$0]  %s3414_s5, 1024, %s45_s26, [#allocation8], %s2794_s28, %s2794_s28, %s2795_s29  }
   0xe   :  { %s2796_s15 = smov [#allocation10]   ;;  %s2797_s17 = smov [#allocation5]  }
   0xf   :  { %s66_s16 = sshll.u32 %s2796_s15, 4  ;;  %s31_s18 = sshll.u32 %s2797_s17, 4  ;;  %s67_s16 = int_to_ptr.vmem [resolvable:$true] %s66_s16  ;;  %s32_s18 = int_to_ptr.vmem [resolvable:$true] %s31_s18 }
  0x10   :  { %s2715_s19 = scalar_lea.vmem %s67_s16, 1024  ;;  %p2720_p6 = scmp.lt.s32.totalorder %s67_s16, %s67_s16 }
  0x11   :  { %p2716_p5 = scmp.ne.s32.totalorder %s67_s16, %s2715_s19  ;;  %p2721_p7 = scmp.lt.s32.totalorder %s2715_s19, %s2715_s19 }
  0x13   :  { %p2722_p8 = por %p2721_p7, %p2720_p6 }
  0x15   :  { %p2723_p9 = pnand %p2722_p8, %p2716_p5 }
  0x17   :  { %2726 = shalt.err (!%p2723_p9)
}
  0x18   :  { %72 = dma.hbm_to_vmem [thread:$0]  %s3416_s7, 1024, %s67_s16, [#allocation11], %s2794_s28, %s2794_s28, %s2795_s29  }
  0x19   :  { %s2735_s22 = scalar_lea.vmem %s32_s18, 32  ;;  %p2740_p11 = scmp.lt.s32.totalorder %s32_s18, %s32_s18 }
  0x1a   :  { %p2736_p10 = scmp.ne.s32.totalorder %s32_s18, %s2735_s22  ;;  %p2741_p12 = scmp.lt.s32.totalorder %s2735_s22, %s2735_s22 }
  0x1c   :  { %p2742_p13 = por %p2741_p12, %p2740_p11 }
  0x1e   :  { %p2743_p0 = pnand %p2742_p13, %p2736_p10 }
  0x20   :  { %2746 = shalt.err (!%p2743_p0)
}
  0x21   :  { %34 = dma.hbm_to_vmem [thread:$0]  %s3411_s2, 32, %s32_s18, [#allocation6]  }
  0x22   :  { %s2798_s24 = smov [#allocation9]   ;;  %s2799_s26 = smov [#allocation12]  }
  0x23   :  { %s57_s25 = sshll.u32 %s2798_s24, 4  ;;  %s79_s27 = sshll.u32 %s2799_s26, 4  ;;  %s58_s25 = int_to_ptr.vmem [resolvable:$true] %s57_s25  ;;  %s80_s27 = int_to_ptr.vmem [resolvable:$true] %s79_s27 }
  0x24   :  { %s2755_s30 = scalar_lea.vmem %s58_s25, 32  ;;  %p2760_p2 = scmp.lt.s32.totalorder %s58_s25, %s58_s25 }
  0x25   :  { %p2756_p1 = scmp.ne.s32.totalorder %s58_s25, %s2755_s30  ;;  %p2761_p3 = scmp.lt.s32.totalorder %s2755_s30, %s2755_s30 }
  0x27   :  { %p2762_p4 = por %p2761_p3, %p2760_p2 }
  0x29   :  { %p2763_p5 = pnand %p2762_p4, %p2756_p1 }
  0x2b   :  { %2766 = shalt.err (!%p2763_p5)
}
  0x2c   :  { %60 = dma.hbm_to_vmem [thread:$0]  %s3415_s6, 32, %s58_s25, [#allocation8]  }
  0x2d   :  { %s2775_s29 = scalar_lea.vmem %s80_s27, 32  ;;  %p2780_p7 = scmp.lt.s32.totalorder %s80_s27, %s80_s27 }
  0x2e   :  { %p2776_p6 = scmp.ne.s32.totalorder %s80_s27, %s2775_s29  ;;  %p2781_p8 = scmp.lt.s32.totalorder %s2775_s29, %s2775_s29 }
  0x30   :  { %p2782_p9 = por %p2781_p8, %p2780_p7 }
  0x32   :  { %p2783_p10 = pnand %p2782_p9, %p2776_p6 }
  0x34   :  { %2786 = shalt.err (!%p2783_p10)
}
  0x35   :  { %82 = dma.hbm_to_vmem [thread:$0]  %s3417_s8, 32, %s80_s27, [#allocation11]  }
  0x36   :  { %2787 = dma.done.wait [#allocation6], 32  }
  0x37   :  { %2788 = vsyncadd [#allocation6], 4294967264 }
  0x38   :  { %2789 = dma.done.wait [#allocation8], 1056  }
  0x39   :  { %2790 = vsyncadd [#allocation8], 4294966240 }
  0x3a   :  { %2791 = dma.done.wait [#allocation11], 1056  }
  0x3b   :  { %2792 = vsyncadd [#allocation11], 4294966240  ;;  %v2800_v0 = vmov 0   ;;  %v2413_v1 = vld [vmem:[%s3410_s1 + $0x14] ss:$8 sps:$4 sm:$0xff]   ;;  %v2425_v9 = vld [vmem:[%s3409_s0] sm:$0xff]   ;;  %v137_v14 = vlaneseq }
  0x3c   :  { %232 = vmatprep.mubr.bf16.mxu0 %v2800_v0  ;;  %370 = vmatprep.mubr.bf16.mxu1 %v2800_v0  ;;  %v2897_v2 = vld [vmem:[%s3412_s3 + $0x34] ss:$8 sps:$4 sm:$0xff]   ;;  %v2417_v3 = vld [vmem:[%s3410_s1 + $0x10] ss:$8 sps:$4 sm:$0xff]   ;;  %v2419_v5 = vld [vmem:[%s3410_s1 + $0x4] ss:$8 sps:$4 sm:$0xff]  }
  0x3d   :  { %212 = vmatprep.subr.bf16.mxu0 %v2413_v1  ;;  %v2905_v4 = vld [vmem:[%s3412_s3 + $0x30] ss:$8 sps:$4 sm:$0xff]   ;;  %346 = vmatprep.subr.bf16.mxu1 %v2897_v2  ;;  %v2915_v6 = vld [vmem:[%s3412_s3 + $0x24] ss:$8 sps:$4 sm:$0xff]   ;;  %v2423_v7 = vld [vmem:[%s3410_s1] ss:$8 sps:$4 sm:$0xff]  }
  0x3e   :  { %213 = vmatpush1.bf16.msra.mxu0 %v2417_v3  ;;  %347 = vmatpush1.bf16.msra.mxu1 %v2905_v4  ;;  %v2923_v8 = vld [vmem:[%s3412_s3 + $0x20] ss:$8 sps:$4 sm:$0xff]   ;;  %v2932_v10 = vld [vmem:[%s3412_s3 + $0x14] ss:$8 sps:$4 sm:$0xff]   ;;  %vm187_vm0 = vcmask 261120   ;;  %v138_v15 = vshrl.u32 %v137_v14, 7 }
  0x3f   :  { %214 = vmatprep.subr.bf16.mxu0 %v2419_v5  ;;  %348 = vmatprep.subr.bf16.mxu1 %v2915_v6  ;;  %v2938_v11 = vld [vmem:[%s3412_s3 + $0x10] ss:$8 sps:$4 sm:$0xff]   ;;  %v2944_v12 = vld [vmem:[%s3412_s3 + $0x4] ss:$8 sps:$4 sm:$0xff]   ;;  %v2950_v13 = vld [vmem:[%s3412_s3] ss:$8 sps:$4 sm:$0xff]  }
  0x40   :  { %v2976_v16 = vsub.s32 0, %v138_v15  ;;  %v135_v17 = vld [vmem:[#allocation5] sm:$0x3]  ;;  %v2981_v19 = vsub.s32 1, %v138_v15  ;;  %s2801_s3 = smov 64   ;;  %vm413_vm1 = vcmask 523520  }
  0x41   :  { %vm334_vm2 = vcmask 523264   ;;  %v2432_v5 = vld [vmem:[%s3409_s0 + $0x8] sm:$0xff]   ;;  %vm2803_vm3 = vmmov 0   ;;  %vm2223_vm4 = vcmask 31744  }
  0x42   :  { %215 = vmatpush1.bf16.msra.mxu0 %v2423_v7  ;;  %349 = vmatpush1.bf16.msra.mxu1 %v2923_v8  ;;  %v2979_v18 = vrot.slane %v135_v17, %v2976_v16  ;;  %v2985_v22 = vrot.slane %v135_v17, %v2981_v19  ;;  %v2433_v7 = vld [vmem:[%s3409_s0 + $0x10] sm:$0xff]  }
  0x43   :  { %350 = vmatprep.subr.bf16.mxu1 %v2932_v10  ;;  %518 = vmatprep.subr.bf16.mxu0 %v2897_v2 }
  0x45   :  { %2254 = vmatmul.mubr.msk.bf16.vlgmr.msra.gmra.mxu0 %vm187_vm0, %v2425_v9  ;;  %v2434_v9 = vld [vmem:[%s3409_s0 + $0x18] sm:$0xff]  }
  0x46   :  { %351 = vmatpush1.bf16.msra.mxu1 %v2938_v11  ;;  %519 = vmatpush1.bf16.msra.mxu0 %v2905_v4 }
  0x47   :  { %352 = vmatprep.subr.bf16.mxu1 %v2944_v12  ;;  %242 = vmatprep.mubr.bf16.mxu0 %v2800_v0 }
  0x48   :  { %520 = vmatprep.subr.bf16.mxu0 %v2915_v6 }
  0x4a   :  { %353 = vmatpush1.bf16.msra.mxu1 %v2950_v13  ;;  %521 = vmatpush1.bf16.msra.mxu0 %v2923_v8 }
  0x4b   :  { %432 = vmatprep.subr.bf16.mxu1 %v2897_v2  ;;  %522 = vmatprep.subr.bf16.mxu0 %v2932_v10 }
  0x4d   :  { %371 = vmatmul.mubr.bf16.vlgmr.msra.gmra.mxu1 %v2800_v0  ;;  %2255 = vmatmul.mubr.msk.bf16.gmra.mxu0 %vm187_vm0, %v2432_v5 }
  0x4e   :  { %433 = vmatpush1.bf16.msra.mxu1 %v2905_v4  ;;  %456 = vmatprep.mubr.bf16.mxu1 %v2800_v0 }
  0x4f   :  { %434 = vmatprep.subr.bf16.mxu1 %v2915_v6  ;;  %523 = vmatpush1.bf16.msra.mxu0 %v2938_v11 }
  0x50   :  { %524 = vmatprep.subr.bf16.mxu0 %v2944_v12  ;;  %252 = vmatprep.mubr.bf16.mxu0 %v2800_v0 }
  0x52   :  { %435 = vmatpush1.bf16.msra.mxu1 %v2923_v8 }
  0x53   :  { %436 = vmatprep.subr.bf16.mxu1 %v2932_v10  ;;  %525 = vmatpush1.bf16.msra.mxu0 %v2950_v13 }
  0x54   :  { %690 = vmatprep.subr.bf16.mxu0 %v2897_v2 }
  0x55   :  { %2256 = vmatmul.mubr.msk.bf16.gmra.mxu0 %vm187_vm0, %v2433_v7 }
  0x56   :  { %437 = vmatpush1.bf16.msra.mxu1 %v2938_v11  ;;  %262 = vmatprep.mubr.bf16.mxu0 %v2800_v0 }
  0x57   :  { %438 = vmatprep.subr.bf16.mxu1 %v2944_v12 }
  0x5a   :  { %439 = vmatpush1.bf16.msra.mxu1 %v2950_v13 }
  0x5b   :  { %604 = vmatprep.subr.bf16.mxu1 %v2897_v2 }
  0x5d   :  { %2257 = vmatmul.mubr.msk.bf16.gmra.mxu0 %vm187_vm0, %v2434_v9 }
  0x5e   :  { %542 = vmatprep.mubr.bf16.mxu0 %v2800_v0 }
 0x105   :  { %v234_v20 = vpop.f32.mrf.mxu0 }
 0x106   :  { %v235_v21 = vadd.f32 %v234_v20, %v2979_v18 }
 0x107   :  { %v236_v23 = vpop.f32.mrf.mxu0 }
 0x108   :  { %v237_v25 = vadd.f32 %v236_v23, %v2985_v22 }
 0x109   :  { %v238_v49 = vpop.f32.mrf.mxu0 }
 0x10a   :  { %v239_v51 = vadd.f32 %v238_v49, %v2979_v18 }
 0x10b   :  { %v240_v50 = vpop.f32.mrf.mxu0 }
 0x10c   :  { %v241_v53 = vadd.f32 %v240_v50, %v2985_v22 }
 0x10d   :  { %v372_v24 = vpop.f32.mrf.mxu1 }
 0x10e   :  { %v379_v26 = vadd.f32 %v372_v24, %v235_v21 }
 0x10f   :  { %v374_v27 = vpop.f32.mrf.mxu1 }
 0x110   :  { %v380_v28 = vadd.f32 %v374_v27, %v237_v25  ;;  %v2266_v32 = vmul.f32 -1.442695, %v379_v26 }
 0x111   :  { %v376_v29 = vpop.f32.mrf.mxu1 }
 0x112   :  { %2481 = vtanh.f32 %v380_v28  ;;  %v2267_v42 = vmul.f32 -1.442695, %v380_v28  ;;  %v244_v29 = vpop.f32.mrf.mxu0 }
 0x113   :  { %v377_v30 = vpop.f32.mrf.mxu1  ;;  %2483 = vpow2.f32 %v2266_v32 }
 0x114   :  { %v246_v30 = vpop.f32.mrf.mxu0 }
 0x11f   :  { %v2482_v31 = vpop.eup %2481 }
 0x120   :  { %396 = vrot.lane.b32.xlu0 %v2482_v31, %s2801_s3  ;;  %v2484_v33 = vpop.eup %2483  ;;  %v248_v31 = vpop.f32.mrf.mxu0 }
 0x121   :  { %v387_v34 = vadd.f32 1.0, %v2484_v33  ;;  %v249_v7 = vadd.f32 %v248_v31, %v2979_v18 }
 0x122   :  { %v250_v32 = vpop.f32.mrf.mxu0 }
 0x123   :  { %2485 = vrcp.f32 %v387_v34 }
 0x124   :  { %v3035_v33 = vpop.f32.mrf.mxu0 }
 0x126   :  { %v3037_v34 = vpop.f32.mrf.mxu0 }
 0x130   :  { %v2486_v35 = vpop.eup %2485 }
 0x131   :  { %v394_v38 = vmul.f32 0.0, %v2486_v35 }
 0x192   :  { %v397_v36 = vpop.permute.xlu0 %396 }
 0x193   :  { %v399_v37 = vmul.f32 %v2486_v35, %v397_v36  ;;  %v3039_v35 = vpop.f32.mrf.mxu0 }
 0x195   :  { %401 = vrot.lane.b32.xlu0 %v399_v37, %s2801_s3  ;;  %v3041_v36 = vpop.f32.mrf.mxu0 }
 0x197   :  { %v3043_v37 = vpop.f32.mrf.mxu0 }
 0x207   :  { %v402_v39 = vpop.permute.xlu0 %401 }
 0x208   :  { %v404_v40 = vadd.f32 %v402_v39, %v394_v38  ;;  %v3045_v38 = vpop.f32.mrf.mxu0 }
 0x20a   :  { %2487 = vtanh.f32 %v404_v40  ;;  %v3047_v39 = vpop.f32.mrf.mxu0 }
 0x20b   :  { %2489 = vpow2.f32 %v2267_v42 }
 0x217   :  { %v2488_v41 = vpop.eup %2487 }
 0x218   :  { %407 = vrot.lane.b32.xlu1 %v2488_v41, %s2801_s3  ;;  %v2490_v43 = vpop.eup %2489  ;;  %v245_v41 = vadd.f32 %v244_v29, %v2979_v18 }
 0x219   :  { %v388_v44 = vadd.f32 1.0, %v2490_v43  ;;  %v247_v43 = vadd.f32 %v246_v30, %v2985_v22 }
 0x21b   :  { %2491 = vrcp.f32 %v388_v44 }
 0x228   :  { %v2492_v45 = vpop.eup %2491 }
 0x28a   :  { %v408_v46 = vpop.permute.xlu1 %407 }
 0x28b   :  { %v410_v47 = vmul.f32 %v2492_v45, %v408_v46 }
 0x28d   :  { %411 = vst.msk [vmem:[#allocation4] sm:$0xff] %vm187_vm0, %v410_v47  ;;  %v420_v48 = vpack.c.bf16 %v410_v47, %v410_v47 }
 0x28e   :  { %414 = vst.msk [vmem:[#allocation4 + $0x38] sm:$0xff] %vm413_vm1, %v410_v47 }
 0x28f   :  { %2268 = vmatmul.mubr.msk.bf16.vlgmr.msra.gmra.mxu1 %vm334_vm2, %v420_v48 }
 0x290   :  { %605 = vmatpush1.bf16.msra.mxu1 %v2905_v4  ;;  %628 = vmatprep.mubr.bf16.mxu1 %v2800_v0 }
 0x291   :  { %606 = vmatprep.subr.bf16.mxu1 %v2915_v6 }
 0x294   :  { %607 = vmatpush1.bf16.msra.mxu1 %v2923_v8 }
 0x295   :  { %608 = vmatprep.subr.bf16.mxu1 %v2932_v10 }
 0x298   :  { %609 = vmatpush1.bf16.msra.mxu1 %v2938_v11 }
 0x299   :  { %610 = vmatprep.subr.bf16.mxu1 %v2944_v12 }
 0x29c   :  { %611 = vmatpush1.bf16.msra.mxu1 %v2950_v13 }
 0x29d   :  { %774 = vmatprep.subr.bf16.mxu1 %v2897_v2 }
 0x34f   :  { %v458_v52 = vpop.f32.mrf.mxu1 }
 0x350   :  { %v465_v54 = vadd.f32 %v458_v52, %v239_v51 }
 0x351   :  { %v460_v55 = vpop.f32.mrf.mxu1 }
 0x352   :  { %v466_v56 = vadd.f32 %v460_v55, %v241_v53  ;;  %v2269_v60 = vmul.f32 -1.442695, %v465_v54 }
 0x353   :  { %v462_v57 = vpop.f32.mrf.mxu1 }
 0x354   :  { %2493 = vtanh.f32 %v466_v56  ;;  %v2270_v21 = vmul.f32 -1.442695, %v466_v56 }
 0x355   :  { %v463_v58 = vpop.f32.mrf.mxu1  ;;  %2495 = vpow2.f32 %v2269_v60 }
 0x361   :  { %v2494_v59 = vpop.eup %2493 }
 0x362   :  { %482 = vrot.lane.b32.xlu1 %v2494_v59, %s2801_s3  ;;  %v2496_v61 = vpop.eup %2495 }
 0x363   :  { %v473_v62 = vadd.f32 1.0, %v2496_v61 }
 0x365   :  { %2497 = vrcp.f32 %v473_v62 }
 0x372   :  { %v2498_v63 = vpop.eup %2497 }
 0x373   :  { %v480_v14 = vmul.f32 %v2498_v63, %v404_v40  ;;  %v3049_v40 = vpop.f32.mrf.mxu0 }
 0x3d4   :  { %v483_v1 = vpop.permute.xlu1 %482 }
 0x3d5   :  { %v485_v3 = vmul.f32 %v2498_v63, %v483_v1 }
 0x3d7   :  { %487 = vrot.lane.b32.xlu0 %v485_v3, %s2801_s3 }
 0x449   :  { %v488_v15 = vpop.permute.xlu0 %487 }
 0x44a   :  { %v490_v17 = vadd.f32 %v488_v15, %v480_v14  ;;  %v251_v14 = vadd.f32 %v250_v32, %v2985_v22 }
 0x44c   :  { %2499 = vtanh.f32 %v490_v17 }
 0x44d   :  { %2501 = vpow2.f32 %v2270_v21 }
 0x459   :  { %v2500_v20 = vpop.eup %2499 }
 0x45a   :  { %493 = vrot.lane.b32.xlu1 %v2500_v20, %s2801_s3  ;;  %v2502_v23 = vpop.eup %2501 }
 0x45b   :  { %v474_v24 = vadd.f32 1.0, %v2502_v23 }
 0x45d   :  { %2503 = vrcp.f32 %v474_v24 }
 0x46a   :  { %v2504_v25 = vpop.eup %2503 }
 0x4cc   :  { %v494_v26 = vpop.permute.xlu1 %493 }
 0x4cd   :  { %v496_v27 = vmul.f32 %v2504_v25, %v494_v26 }
 0x4cf   :  { %498 = vst.msk [vmem:[#allocation4 + $0x8] sm:$0xff] %vm187_vm0, %v496_v27  ;;  %v506_v28 = vpack.c.bf16 %v496_v27, %v496_v27 }
 0x4d0   :  { %500 = vst.msk [vmem:[#allocation4 + $0x30] sm:$0xff] %vm413_vm1, %v496_v27 }
 0x4d1   :  { %2271 = vmatmul.mubr.msk.bf16.vlgmr.msra.gmra.mxu0 %vm334_vm2, %v506_v28 }
 0x4d2   :  { %691 = vmatpush1.bf16.msra.mxu0 %v2905_v4  ;;  %714 = vmatprep.mubr.bf16.mxu0 %v2800_v0 }
 0x4d3   :  { %692 = vmatprep.subr.bf16.mxu0 %v2915_v6 }
 0x4d6   :  { %693 = vmatpush1.bf16.msra.mxu0 %v2923_v8 }
 0x4d7   :  { %694 = vmatprep.subr.bf16.mxu0 %v2932_v10 }
 0x4da   :  { %695 = vmatpush1.bf16.msra.mxu0 %v2938_v11 }
 0x4db   :  { %696 = vmatprep.subr.bf16.mxu0 %v2944_v12 }
 0x4de   :  { %697 = vmatpush1.bf16.msra.mxu0 %v2950_v13 }
 0x4df   :  { %858 = vmatprep.subr.bf16.mxu0 %v2897_v2 }
 0x591   :  { %v544_v42 = vpop.f32.mrf.mxu0 }
 0x592   :  { %v551_v44 = vadd.f32 %v544_v42, %v245_v41 }
 0x593   :  { %v546_v45 = vpop.f32.mrf.mxu0 }
 0x594   :  { %v552_v46 = vadd.f32 %v546_v45, %v247_v43  ;;  %v2272_v50 = vmul.f32 -1.442695, %v551_v44 }
 0x595   :  { %v548_v47 = vpop.f32.mrf.mxu0 }
 0x596   :  { %2505 = vtanh.f32 %v552_v46  ;;  %v2273_v60 = vmul.f32 -1.442695, %v552_v46 }
 0x597   :  { %v549_v48 = vpop.f32.mrf.mxu0  ;;  %2507 = vpow2.f32 %v2272_v50 }
 0x5a3   :  { %v2506_v49 = vpop.eup %2505 }
 0x5a4   :  { %568 = vrot.lane.b32.xlu0 %v2506_v49, %s2801_s3  ;;  %v2508_v51 = vpop.eup %2507  ;;  %v255_v49 = vadd.f32 %v3035_v33, %v2979_v18 }
 0x5a5   :  { %v559_v52 = vadd.f32 1.0, %v2508_v51  ;;  %v257_v51 = vadd.f32 %v3037_v34, %v2985_v22 }
 0x5a7   :  { %2509 = vrcp.f32 %v559_v52 }
 0x5b4   :  { %v2510_v53 = vpop.eup %2509 }
 0x5b5   :  { %v566_v56 = vmul.f32 %v2510_v53, %v490_v17 }
 0x616   :  { %v569_v54 = vpop.permute.xlu0 %568 }
 0x617   :  { %v571_v55 = vmul.f32 %v2510_v53, %v569_v54 }
 0x619   :  { %573 = vrot.lane.b32.xlu1 %v571_v55, %s2801_s3 }
 0x68b   :  { %v574_v57 = vpop.permute.xlu1 %573 }
 0x68c   :  { %v576_v58 = vadd.f32 %v574_v57, %v566_v56 }
 0x68e   :  { %2511 = vtanh.f32 %v576_v58 }
 0x68f   :  { %2513 = vpow2.f32 %v2273_v60 }
 0x69b   :  { %v2512_v59 = vpop.eup %2511 }
 0x69c   :  { %579 = vrot.lane.b32.xlu0 %v2512_v59, %s2801_s3  ;;  %v2514_v61 = vpop.eup %2513 }
 0x69d   :  { %v560_v62 = vadd.f32 1.0, %v2514_v61 }
 0x69f   :  { %2515 = vrcp.f32 %v560_v62 }
 0x6ac   :  { %v2516_v63 = vpop.eup %2515 }
 0x70e   :  { %v580_v1 = vpop.permute.xlu0 %579 }
 0x70f   :  { %v582_v3 = vmul.f32 %v2516_v63, %v580_v1 }
 0x711   :  { %584 = vst.msk [vmem:[#allocation4 + $0x10] sm:$0xff] %vm187_vm0, %v582_v3  ;;  %v592_v5 = vpack.c.bf16 %v582_v3, %v582_v3 }
 0x712   :  { %586 = vst.msk [vmem:[#allocation4 + $0x28] sm:$0xff] %vm413_vm1, %v582_v3 }
 0x713   :  { %2274 = vmatmul.mubr.msk.bf16.vlgmr.msra.gmra.mxu1 %vm334_vm2, %v592_v5 }
 0x714   :  { %775 = vmatpush1.bf16.msra.mxu1 %v2905_v4  ;;  %798 = vmatprep.mubr.bf16.mxu1 %v2800_v0 }
 0x715   :  { %776 = vmatprep.subr.bf16.mxu1 %v2915_v6 }
 0x718   :  { %777 = vmatpush1.bf16.msra.mxu1 %v2923_v8 }
 0x719   :  { %778 = vmatprep.subr.bf16.mxu1 %v2932_v10 }
 0x71c   :  { %779 = vmatpush1.bf16.msra.mxu1 %v2938_v11 }
 0x71d   :  { %780 = vmatprep.subr.bf16.mxu1 %v2944_v12 }
 0x720   :  { %781 = vmatpush1.bf16.msra.mxu1 %v2950_v13 }
 0x721   :  { %942 = vmatprep.subr.bf16.mxu1 %v2897_v2 }
 0x7d3   :  { %v630_v9 = vpop.f32.mrf.mxu1 }
 0x7d4   :  { %v637_v15 = vadd.f32 %v630_v9, %v249_v7 }
 0x7d5   :  { %v632_v17 = vpop.f32.mrf.mxu1 }
 0x7d6   :  { %v638_v20 = vadd.f32 %v632_v17, %v251_v14  ;;  %v2275_v25 = vmul.f32 -1.442695, %v637_v15 }
 0x7d7   :  { %v634_v21 = vpop.f32.mrf.mxu1 }
 0x7d8   :  { %2517 = vtanh.f32 %v638_v20  ;;  %v2276_v42 = vmul.f32 -1.442695, %v638_v20  ;;  %v259_v21 = vadd.f32 %v3039_v35, %v2979_v18 }
 0x7d9   :  { %v635_v23 = vpop.f32.mrf.mxu1  ;;  %2519 = vpow2.f32 %v2275_v25 }
 0x7e5   :  { %v2518_v24 = vpop.eup %2517 }
 0x7e6   :  { %654 = vrot.lane.b32.xlu1 %v2518_v24, %s2801_s3  ;;  %v2520_v26 = vpop.eup %2519 }
 0x7e7   :  { %v645_v27 = vadd.f32 1.0, %v2520_v26 }
 0x7e9   :  { %2521 = vrcp.f32 %v645_v27 }
 0x7f6   :  { %v2522_v2 = vpop.eup %2521 }
 0x7f7   :  { %v652_v30 = vmul.f32 %v2522_v2, %v576_v58 }
 0x858   :  { %v655_v28 = vpop.permute.xlu1 %654 }
 0x859   :  { %v657_v29 = vmul.f32 %v2522_v2, %v655_v28 }
 0x85b   :  { %659 = vrot.lane.b32.xlu0 %v657_v29, %s2801_s3 }
 0x8cd   :  { %v660_v31 = vpop.permute.xlu0 %659 }
 0x8ce   :  { %v662_v32 = vadd.f32 %v660_v31, %v652_v30 }
 0x8d0   :  { %2523 = vtanh.f32 %v662_v32 }
 0x8d1   :  { %2525 = vpow2.f32 %v2276_v42 }
 0x8dd   :  { %v2524_v41 = vpop.eup %2523 }
 0x8de   :  { %665 = vrot.lane.b32.xlu1 %v2524_v41, %s2801_s3  ;;  %v2526_v43 = vpop.eup %2525 }
 0x8df   :  { %v646_v44 = vadd.f32 1.0, %v2526_v43 }
 0x8e1   :  { %2527 = vrcp.f32 %v646_v44 }
 0x8ee   :  { %v2528_v45 = vpop.eup %2527 }
 0x950   :  { %v666_v46 = vpop.permute.xlu1 %665 }
 0x951   :  { %v668_v47 = vmul.f32 %v2528_v45, %v666_v46  ;;  %v265_v46 = vadd.f32 %v3043_v37, %v2979_v18 }
 0x953   :  { %670 = vst.msk [vmem:[#allocation4 + $0x18] sm:$0xff] %vm187_vm0, %v668_v47  ;;  %v678_v48 = vpack.c.bf16 %v668_v47, %v668_v47 }
 0x954   :  { %672 = vst.msk [vmem:[#allocation4 + $0x20] sm:$0xff] %vm413_vm1, %v668_v47 }
 0x955   :  { %2277 = vmatmul.mubr.msk.bf16.vlgmr.msra.gmra.mxu0 %vm334_vm2, %v678_v48  ;;  %v267_v48 = vadd.f32 %v3045_v38, %v2985_v22 }
 0x956   :  { %859 = vmatpush1.bf16.msra.mxu0 %v2905_v4  ;;  %882 = vmatprep.mubr.bf16.mxu0 %v2800_v0 }
 0x957   :  { %860 = vmatprep.subr.bf16.mxu0 %v2915_v6 }
 0x95a   :  { %861 = vmatpush1.bf16.msra.mxu0 %v2923_v8 }
 0x95b   :  { %862 = vmatprep.subr.bf16.mxu0 %v2932_v10 }
 0x95e   :  { %863 = vmatpush1.bf16.msra.mxu0 %v2938_v11 }
 0x95f   :  { %864 = vmatprep.subr.bf16.mxu0 %v2944_v12 }
 0x962   :  { %865 = vmatpush1.bf16.msra.mxu0 %v2950_v13 }
 0xa15   :  { %v716_v50 = vpop.f32.mrf.mxu0 }
 0xa16   :  { %v723_v52 = vadd.f32 %v716_v50, %v255_v49 }
 0xa17   :  { %v718_v53 = vpop.f32.mrf.mxu0 }
 0xa18   :  { %v724_v54 = vadd.f32 %v718_v53, %v257_v51  ;;  %v2278_v58 = vmul.f32 -1.442695, %v723_v52 }
 0xa19   :  { %v720_v55 = vpop.f32.mrf.mxu0 }
 0xa1a   :  { %2529 = vtanh.f32 %v724_v54  ;;  %v2279_v5 = vmul.f32 -1.442695, %v724_v54 }
 0xa1b   :  { %v721_v56 = vpop.f32.mrf.mxu0  ;;  %2531 = vpow2.f32 %v2278_v58 }
 0xa27   :  { %v2530_v57 = vpop.eup %2529 }
 0xa28   :  { %740 = vrot.lane.b32.xlu0 %v2530_v57, %s2801_s3  ;;  %v2532_v59 = vpop.eup %2531 }
 0xa29   :  { %v731_v60 = vadd.f32 1.0, %v2532_v59 }
 0xa2b   :  { %2533 = vrcp.f32 %v731_v60 }
 0xa38   :  { %v2534_v61 = vpop.eup %2533 }
 0xa39   :  { %v738_v34 = vmul.f32 %v2534_v61, %v662_v32 }
 0xa9a   :  { %v741_v33 = vpop.permute.xlu0 %740 }
 0xa9b   :  { %v743_v62 = vmul.f32 %v2534_v61, %v741_v33 }
 0xa9d   :  { %745 = vrot.lane.b32.xlu1 %v743_v62, %s2801_s3 }
 0xb0f   :  { %v746_v63 = vpop.permute.xlu1 %745 }
 0xb10   :  { %v748_v1 = vadd.f32 %v746_v63, %v738_v34 }
 0xb12   :  { %2535 = vtanh.f32 %v748_v1 }
 0xb13   :  { %2537 = vpow2.f32 %v2279_v5 }
 0xb1f   :  { %v2536_v3 = vpop.eup %2535 }
 0xb20   :  { %751 = vrot.lane.b32.xlu0 %v2536_v3, %s2801_s3  ;;  %v2538_v7 = vpop.eup %2537 }
 0xb21   :  { %v732_v9 = vadd.f32 1.0, %v2538_v7 }
 0xb23   :  { %2539 = vrcp.f32 %v732_v9  ;;  %v269_v9 = vadd.f32 %v3047_v39, %v2979_v18 }
 0xb30   :  { %v2540_v14 = vpop.eup %2539 }
 0xb92   :  { %v752_v15 = vpop.permute.xlu0 %751 }
 0xb93   :  { %v754_v17 = vmul.f32 %v2540_v14, %v752_v15  ;;  %v271_v15 = vadd.f32 %v3049_v40, %v2985_v22  ;;  %v3135_v40 = vld [vmem:[#allocation7 + $0x30] ss:$8 sps:$4 sm:$0xff]  }
 0xb95   :  { %755 = vst.msk [vmem:[#allocation4 + $0x20] sm:$0xff] %vm187_vm0, %v754_v17  ;;  %v762_v20 = vpack.c.bf16 %v754_v17, %v754_v17 }
 0xb96   :  { %756 = vst.msk [vmem:[#allocation4 + $0x18] sm:$0xff] %vm413_vm1, %v754_v17 }
 0xb97   :  { %2280 = vmatmul.mubr.msk.bf16.vlgmr.msra.gmra.mxu1 %vm334_vm2, %v762_v20 }
 0xb98   :  { %943 = vmatpush1.bf16.msra.mxu1 %v2905_v4  ;;  %966 = vmatprep.mubr.bf16.mxu1 %v2800_v0  ;;  %v261_v4 = vadd.f32 %v3041_v36, %v2985_v22  ;;  %v3133_v22 = vld [vmem:[#allocation7 + $0x34] ss:$8 sps:$4 sm:$0xff]  }
 0xb99   :  { %944 = vmatprep.subr.bf16.mxu1 %v2915_v6 }
 0xb9c   :  { %945 = vmatpush1.bf16.msra.mxu1 %v2923_v8 }
 0xb9d   :  { %946 = vmatprep.subr.bf16.mxu1 %v2932_v10 }
 0xba0   :  { %947 = vmatpush1.bf16.msra.mxu1 %v2938_v11 }
 0xba1   :  { %948 = vmatprep.subr.bf16.mxu1 %v2944_v12 }
 0xba4   :  { %949 = vmatpush1.bf16.msra.mxu1 %v2950_v13 }
 0xba5   :  { %1234 = vmatprep.subr.bf16.mxu1 %v3133_v22 }
 0xc57   :  { %v800_v23 = vpop.f32.mrf.mxu1 }
 0xc58   :  { %v807_v24 = vadd.f32 %v800_v23, %v259_v21 }
 0xc59   :  { %v802_v25 = vpop.f32.mrf.mxu1 }
 0xc5a   :  { %v808_v6 = vadd.f32 %v802_v25, %v261_v4  ;;  %v2281_v11 = vmul.f32 -1.442695, %v807_v24 }
 0xc5b   :  { %v804_v26 = vpop.f32.mrf.mxu1 }
 0xc5c   :  { %2541 = vtanh.f32 %v808_v6  ;;  %v2282_v31 = vmul.f32 -1.442695, %v808_v6 }
 0xc5d   :  { %v805_v8 = vpop.f32.mrf.mxu1  ;;  %2543 = vpow2.f32 %v2281_v11  ;;  %v2440_v11 = vld [vmem:[%s3413_s4 + $0x34] ss:$8 sps:$4 sm:$0xff]  }
 0xc5e   :  { %1101 = vmatprep.subr.bf16.mxu0 %v2440_v11 }
 0xc69   :  { %v2542_v10 = vpop.eup %2541 }
 0xc6a   :  { %824 = vrot.lane.b32.xlu1 %v2542_v10, %s2801_s3  ;;  %v2544_v12 = vpop.eup %2543  ;;  %v2438_v10 = vld [vmem:[%s3413_s4 + $0x30] ss:$8 sps:$4 sm:$0xff]  }
 0xc6b   :  { %v815_v13 = vadd.f32 1.0, %v2544_v12  ;;  %v3143_v12 = vld [vmem:[#allocation7 + $0x24] ss:$8 sps:$4 sm:$0xff]  }
 0xc6d   :  { %2545 = vrcp.f32 %v815_v13  ;;  %v3147_v13 = vld [vmem:[#allocation7 + $0x20] ss:$8 sps:$4 sm:$0xff]  }
 0xc7a   :  { %v2546_v27 = vpop.eup %2545 }
 0xc7b   :  { %v822_v36 = vmul.f32 %v2546_v27, %v748_v1 }
 0xcdc   :  { %v825_v35 = vpop.permute.xlu1 %824 }
 0xcdd   :  { %v827_v2 = vmul.f32 %v2546_v27, %v825_v35 }
 0xcdf   :  { %829 = vrot.lane.b32.xlu0 %v827_v2, %s2801_s3 }
 0xd51   :  { %v830_v28 = vpop.permute.xlu0 %829 }
 0xd52   :  { %v832_v29 = vadd.f32 %v830_v28, %v822_v36  ;;  %v2446_v36 = vld [vmem:[%s3413_s4 + $0x24] ss:$8 sps:$4 sm:$0xff]   ;;  %v3154_v28 = vld [vmem:[#allocation7 + $0x14] ss:$8 sps:$4 sm:$0xff]  }
 0xd54   :  { %2547 = vtanh.f32 %v832_v29 }
 0xd55   :  { %2549 = vpow2.f32 %v2282_v31  ;;  %v2450_v31 = vld [vmem:[%s3413_s4 + $0x10] ss:$8 sps:$4 sm:$0xff]  }
 0xd61   :  { %v2548_v30 = vpop.eup %2547 }
 0xd62   :  { %835 = vrot.lane.b32.xlu1 %v2548_v30, %s2801_s3  ;;  %v2550_v32 = vpop.eup %2549  ;;  %v3159_v30 = vld [vmem:[#allocation7 + $0x10] ss:$8 sps:$4 sm:$0xff]  }
 0xd63   :  { %v816_v41 = vadd.f32 1.0, %v2550_v32  ;;  %v2452_v32 = vld [vmem:[%s3413_s4 + $0x14] ss:$8 sps:$4 sm:$0xff]  }
 0xd65   :  { %2551 = vrcp.f32 %v816_v41  ;;  %v3169_v41 = vld [vmem:[#allocation7 + $0x4] ss:$8 sps:$4 sm:$0xff]  }
 0xd72   :  { %v2552_v42 = vpop.eup %2551 }
 0xdd4   :  { %v836_v43 = vpop.permute.xlu1 %835 }
 0xdd5   :  { %v838_v44 = vmul.f32 %v2552_v42, %v836_v43  ;;  %v3171_v42 = vld [vmem:[#allocation7] ss:$8 sps:$4 sm:$0xff]  }
 0xdd6   :  { %v2458_v43 = vld [vmem:[%s3413_s4 + $0x4] ss:$8 sps:$4 sm:$0xff]  }
 0xdd7   :  { %839 = vst.msk [vmem:[#allocation4 + $0x28] sm:$0xff] %vm187_vm0, %v838_v44  ;;  %v846_v45 = vpack.c.bf16 %v838_v44, %v838_v44 }
 0xdd8   :  { %840 = vst.msk [vmem:[#allocation4 + $0x10] sm:$0xff] %vm413_vm1, %v838_v44  ;;  %v2456_v44 = vld [vmem:[%s3413_s4] ss:$8 sps:$4 sm:$0xff]  }
 0xdd9   :  { %2283 = vmatmul.mubr.msk.bf16.vlgmr.msra.gmra.mxu0 %vm334_vm2, %v846_v45 }
 0xdda   :  { %1125 = vmatprep.mubr.bf16.mxu0 %v2800_v0  ;;  %1102 = vmatpush1.bf16.msra.mxu0 %v2438_v10 }
 0xddb   :  { %1103 = vmatprep.subr.bf16.mxu0 %v2446_v36 }
 0xe99   :  { %v884_v47 = vpop.f32.mrf.mxu0 }
 0xe9a   :  { %v891_v49 = vadd.f32 %v884_v47, %v265_v46 }
 0xe9b   :  { %v886_v50 = vpop.f32.mrf.mxu0 }
 0xe9c   :  { %v892_v51 = vadd.f32 %v886_v50, %v267_v48  ;;  %v2284_v55 = vmul.f32 -1.442695, %v891_v49 }
 0xe9d   :  { %v888_v52 = vpop.f32.mrf.mxu0 }
 0xe9e   :  { %2553 = vtanh.f32 %v892_v51  ;;  %v2285_v62 = vmul.f32 -1.442695, %v892_v51 }
 0xe9f   :  { %v889_v53 = vpop.f32.mrf.mxu0  ;;  %2555 = vpow2.f32 %v2284_v55  ;;  %v1011_v55 = vld [vmem:[#allocation4 + $0x10] sm:$0xff] }
 0xeab   :  { %v2554_v54 = vpop.eup %2553 }
 0xeac   :  { %908 = vrot.lane.b32.xlu0 %v2554_v54, %s2801_s3  ;;  %v2556_v56 = vpop.eup %2555 }
 0xead   :  { %v899_v57 = vadd.f32 1.0, %v2556_v56  ;;  %v1012_v56 = vld [vmem:[#allocation4 + $0x18] sm:$0xff] }
 0xeaf   :  { %2557 = vrcp.f32 %v899_v57  ;;  %v1018_v57 = vpack.c.bf16 %v1012_v56, %v1011_v55 }
 0xebc   :  { %v2558_v58 = vpop.eup %2557 }
 0xebd   :  { %v906_v38 = vmul.f32 %v2558_v58, %v832_v29  ;;  %v2444_v29 = vld [vmem:[%s3413_s4 + $0x20] ss:$8 sps:$4 sm:$0xff]  }
 0xebe   :  { %1104 = vmatpush1.bf16.msra.mxu0 %v2444_v29 }
 0xebf   :  { %1105 = vmatprep.subr.bf16.mxu0 %v2452_v32 }
 0xec2   :  { %1106 = vmatpush1.bf16.msra.mxu0 %v2450_v31 }
 0xec3   :  { %1107 = vmatprep.subr.bf16.mxu0 %v2458_v43 }
 0xec6   :  { %1108 = vmatpush1.bf16.msra.mxu0 %v2456_v44 }
 0xec7   :  { %1396 = vmatprep.subr.bf16.mxu0 %v3133_v22 }
 0xf1e   :  { %v909_v37 = vpop.permute.xlu0 %908 }
 0xf1f   :  { %v911_v59 = vmul.f32 %v2558_v58, %v909_v37  ;;  %v1014_v58 = vld [vmem:[#allocation4 + $0x28] sm:$0xff]  ;;  %v1013_v37 = vld [vmem:[#allocation4 + $0x20] sm:$0xff] }
 0xf21   :  { %913 = vrot.lane.b32.xlu1 %v911_v59, %s2801_s3  ;;  %v1019_v59 = vpack.c.bf16 %v1014_v58, %v1013_v37 }
 0xf93   :  { %v914_v60 = vpop.permute.xlu1 %913 }
 0xf94   :  { %v916_v61 = vadd.f32 %v914_v60, %v906_v38 }
 0xf96   :  { %2559 = vtanh.f32 %v916_v61 }
 0xf97   :  { %2561 = vpow2.f32 %v2285_v62 }
 0xfa3   :  { %v2560_v33 = vpop.eup %2559 }
 0xfa4   :  { %919 = vrot.lane.b32.xlu0 %v2560_v33, %s2801_s3  ;;  %v2562_v34 = vpop.eup %2561 }
 0xfa5   :  { %v900_v63 = vadd.f32 1.0, %v2562_v34 }
 0xfa7   :  { %2563 = vrcp.f32 %v900_v63 }
 0xfb4   :  { %v2564_v1 = vpop.eup %2563 }
0x1016   :  { %v920_v3 = vpop.permute.xlu0 %919 }
0x1017   :  { %v922_v5 = vmul.f32 %v2564_v1, %v920_v3  ;;  %v1029_v1 = vld [vmem:[#allocation9] sm:$0x3] }
0x1018   :  { %v3217_v3 = vrot.slane %v1029_v1, %v2981_v19 }
0x1019   :  { %923 = vst.msk [vmem:[#allocation4 + $0x30] sm:$0xff] %vm187_vm0, %v922_v5  ;;  %v930_v7 = vpack.c.bf16 %v922_v5, %v922_v5 }
0x101a   :  { %924 = vst.msk [vmem:[#allocation4 + $0x8] sm:$0xff] %vm413_vm1, %v922_v5 }
0x101b   :  { %2286 = vmatmul.mubr.msk.bf16.vlgmr.msra.gmra.mxu1 %vm334_vm2, %v930_v7 }
0x101c   :  { %1258 = vmatprep.mubr.bf16.mxu1 %v2800_v0  ;;  %1235 = vmatpush1.bf16.msra.mxu1 %v3135_v40 }
0x101d   :  { %1236 = vmatprep.subr.bf16.mxu1 %v3143_v12 }
0x1020   :  { %1237 = vmatpush1.bf16.msra.mxu1 %v3147_v13  ;;  %v1015_v60 = vld [vmem:[#allocation4 + $0x30] sm:$0xff] }
0x1021   :  { %1238 = vmatprep.subr.bf16.mxu1 %v3154_v28  ;;  %v1010_v53 = vld [vmem:[#allocation4 + $0x8] sm:$0xff] }
0x1024   :  { %1239 = vmatpush1.bf16.msra.mxu1 %v3159_v30 }
0x1025   :  { %1240 = vmatprep.subr.bf16.mxu1 %v3169_v41 }
0x1028   :  { %1241 = vmatpush1.bf16.msra.mxu1 %v3171_v42 }
0x1029   :  { %1315 = vmatprep.subr.bf16.mxu1 %v3133_v22 }
0x102b   :  { %1259 = vmatmul.mubr.bf16.vlgmr.msra.gmra.mxu1 %v2800_v0 }
0x102c   :  { %1316 = vmatpush1.bf16.msra.mxu1 %v3135_v40  ;;  %1339 = vmatprep.mubr.bf16.mxu1 %v2800_v0 }
0x102d   :  { %1317 = vmatprep.subr.bf16.mxu1 %v3143_v12 }
0x1030   :  { %1318 = vmatpush1.bf16.msra.mxu1 %v3147_v13 }
0x1031   :  { %1319 = vmatprep.subr.bf16.mxu1 %v3154_v28 }
0x1034   :  { %1320 = vmatpush1.bf16.msra.mxu1 %v3159_v30 }
0x1035   :  { %1321 = vmatprep.subr.bf16.mxu1 %v3169_v41 }
0x1038   :  { %1322 = vmatpush1.bf16.msra.mxu1 %v3171_v42 }
0x1039   :  { %1477 = vmatprep.subr.bf16.mxu1 %v3133_v22 }
0x10db   :  { %v968_v14 = vpop.f32.mrf.mxu1 }
0x10dc   :  { %v975_v17 = vadd.f32 %v968_v14, %v269_v9  ;;  %v1034_v9 = vrot.slane %v1029_v1, %v2976_v16 }
0x10dd   :  { %v970_v20 = vpop.f32.mrf.mxu1 }
0x10de   :  { %v3128_v21 = vadd.f32 %v970_v20, %v271_v15  ;;  %v2287_v25 = vmul.f32 -1.442695, %v975_v17 }
0x10df   :  { %v972_v23 = vpop.f32.mrf.mxu1 }
0x10e0   :  { %2565 = vtanh.f32 %v3128_v21  ;;  %v2288_v46 = vmul.f32 -1.442695, %v3128_v21 }
0x10e1   :  { %v973_v4 = vpop.f32.mrf.mxu1  ;;  %2567 = vpow2.f32 %v2287_v25 }
0x10eb   :  { %v1260_v33 = vpop.f32.mrf.mxu1 }
0x10ed   :  { %v2566_v24 = vpop.eup %2565  ;;  %v1262_v62 = vpop.f32.mrf.mxu1 }
0x10ee   :  { %992 = vrot.lane.b32.xlu1 %v2566_v24, %s2801_s3  ;;  %v2568_v6 = vpop.eup %2567 }
0x10ef   :  { %v983_v26 = vadd.f32 1.0, %v2568_v6  ;;  %v1264_v34 = vpop.f32.mrf.mxu1 }
0x10f1   :  { %2569 = vrcp.f32 %v983_v26  ;;  %v1265_v63 = vpop.f32.mrf.mxu1 }
0x10fe   :  { %v2570_v18 = vpop.eup %2569 }
0x10ff   :  { %v990_v27 = vmul.f32 %v2570_v18, %v916_v61 }
0x1160   :  { %v993_v39 = vpop.permute.xlu1 %992 }
0x1161   :  { %v995_v8 = vmul.f32 %v2570_v18, %v993_v39 }
0x1163   :  { %997 = vrot.lane.b32.xlu0 %v995_v8, %s2801_s3 }
0x11d5   :  { %v998_v35 = vpop.permute.xlu0 %997 }
0x11d6   :  { %v1000_v2 = vadd.f32 %v998_v35, %v990_v27 }
0x11d8   :  { %2571 = vtanh.f32 %v1000_v2 }
0x11d9   :  { %2573 = vpow2.f32 %v2288_v46 }
0x11e5   :  { %v2572_v45 = vpop.eup %2571 }
0x11e6   :  { %1003 = vrot.lane.b32.xlu1 %v2572_v45, %s2801_s3  ;;  %v2574_v47 = vpop.eup %2573 }
0x11e7   :  { %v984_v48 = vadd.f32 1.0, %v2574_v47 }
0x11e9   :  { %2575 = vrcp.f32 %v984_v48 }
0x11f6   :  { %v2576_v49 = vpop.eup %2575 }
0x1258   :  { %v1004_v50 = vpop.permute.xlu1 %1003 }
0x1259   :  { %v1006_v51 = vmul.f32 %v2576_v49, %v1004_v50 }
0x125b   :  { %1007 = vst.msk [vmem:[#allocation4 + $0x38] sm:$0xff] %vm187_vm0, %v1006_v51 }
0x125c   :  { %1008 = vst.msk [vmem:[#allocation4] sm:$0xff] %vm413_vm1, %v1006_v51 }
0x1262   :  { %v3211_v38 = vld [vmem:[#allocation4 + $0x38] sm:$0xff] }
0x1263   :  { %v1009_v52 = vld [vmem:[#allocation4] sm:$0xff]  ;;  %v1020_v61 = vpack.c.bf16 %v3211_v38, %v1015_v60 }
0x1264   :  { %v1017_v54 = vpack.c.bf16 %v1010_v53, %v1009_v52 }
0x1266   :  { %2297 = vmatmul.mubr.msk.bf16.vlgmr.msra.gmra.mxu0 %vm334_vm2, %v1017_v54 }
0x1267   :  { %1135 = vmatprep.mubr.bf16.mxu0 %v2800_v0  ;;  %1397 = vmatpush1.bf16.msra.mxu0 %v3135_v40 }
0x1268   :  { %1398 = vmatprep.subr.bf16.mxu0 %v3143_v12 }
0x126b   :  { %1399 = vmatpush1.bf16.msra.mxu0 %v3147_v13 }
0x126c   :  { %1400 = vmatprep.subr.bf16.mxu0 %v3154_v28 }
0x126e   :  { %2298 = vmatmul.mubr.msk.bf16.gmra.mxu0 %vm334_vm2, %v1018_v57 }
0x126f   :  { %1145 = vmatprep.mubr.bf16.mxu0 %v2800_v0  ;;  %1401 = vmatpush1.bf16.msra.mxu0 %v3159_v30 }
0x1270   :  { %1402 = vmatprep.subr.bf16.mxu0 %v3169_v41 }
0x1273   :  { %1403 = vmatpush1.bf16.msra.mxu0 %v3171_v42 }
0x1274   :  { %1558 = vmatprep.subr.bf16.mxu0 %v3133_v22 }
0x1276   :  { %2299 = vmatmul.mubr.msk.bf16.gmra.mxu0 %vm334_vm2, %v1019_v59 }
0x1277   :  { %1155 = vmatprep.mubr.bf16.mxu0 %v2800_v0 }
0x127e   :  { %2300 = vmatmul.mubr.msk.bf16.gmra.mxu0 %vm334_vm2, %v1020_v61 }
0x127f   :  { %1420 = vmatprep.mubr.bf16.mxu0 %v2800_v0 }
0x1326   :  { %v1127_v5 = vpop.f32.mrf.mxu0 }
0x1327   :  { %v1128_v47 = vadd.f32 %v1127_v5, %v1034_v9 }
0x1328   :  { %v1129_v7 = vpop.f32.mrf.mxu0 }
0x1329   :  { %v1130_v14 = vadd.f32 %v1129_v7, %v3217_v3  ;;  %v1267_v48 = vadd.f32 %v1260_v33, %v1128_v47 }
0x132a   :  { %v1131_v15 = vpop.f32.mrf.mxu0 }
0x132b   :  { %v1268_v17 = vadd.f32 %v1262_v62, %v1130_v14  ;;  %v3221_v20 = vadd.f32 %v1131_v15, %v1034_v9  ;;  %v2309_v49 = vmul.f32 -1.442695, %v1267_v48 }
0x132c   :  { %v1133_v21 = vpop.f32.mrf.mxu0 }
0x132d   :  { %2577 = vtanh.f32 %v1268_v17  ;;  %v2310_v37 = vmul.f32 -1.442695, %v1268_v17  ;;  %v1134_v1 = vadd.f32 %v1133_v21, %v3217_v3 }
0x132e   :  { %v1137_v23 = vpop.f32.mrf.mxu0  ;;  %2579 = vpow2.f32 %v2309_v49 }
0x132f   :  { %v3223_v4 = vadd.f32 %v1137_v23, %v1034_v9 }
0x1330   :  { %v3225_v24 = vpop.f32.mrf.mxu0 }
0x1332   :  { %v1141_v25 = vpop.f32.mrf.mxu0 }
0x1333   :  { %v3227_v6 = vadd.f32 %v1141_v25, %v1034_v9 }
0x1334   :  { %v1143_v26 = vpop.f32.mrf.mxu0 }
0x1335   :  { %v3230_v18 = vadd.f32 %v1143_v26, %v3217_v3 }
0x1336   :  { %v1147_v39 = vpop.f32.mrf.mxu0 }
0x1337   :  { %v3232_v8 = vadd.f32 %v1147_v39, %v1034_v9 }
0x1338   :  { %v1149_v10 = vpop.f32.mrf.mxu0 }
0x1339   :  { %v3235_v11 = vadd.f32 %v1149_v10, %v3217_v3 }
0x133a   :  { %v1151_v27 = vpop.f32.mrf.mxu0  ;;  %v2578_v35 = vpop.eup %2577 }
0x133b   :  { %v3237_v2 = vadd.f32 %v1151_v27, %v1034_v9  ;;  %1284 = vrot.lane.b32.xlu0 %v2578_v35, %s2801_s3  ;;  %v2580_v50 = vpop.eup %2579 }
0x133c   :  { %v1153_v36 = vpop.f32.mrf.mxu0  ;;  %v1275_v51 = vadd.f32 1.0, %v2580_v50 }
0x133d   :  { %v3241_v29 = vadd.f32 %v1153_v36, %v3217_v3 }
0x133e   :  { %v1157_v31 = vpop.f32.mrf.mxu0  ;;  %2581 = vrcp.f32 %v1275_v51 }
0x133f   :  { %v3243_v32 = vadd.f32 %v1157_v31, %v1034_v9 }
0x1340   :  { %v1159_v43 = vpop.f32.mrf.mxu0 }
0x1341   :  { %v3246_v44 = vadd.f32 %v1159_v43, %v3217_v3 }
0x1342   :  { %v1161_v45 = vpop.f32.mrf.mxu0 }
0x1343   :  { %v3248_v46 = vadd.f32 %v1161_v45, %v1034_v9 }
0x1344   :  { %v3277_v51 = vpop.f32.mrf.mxu0 }
0x134b   :  { %v2582_v52 = vpop.eup %2581 }
0x134c   :  { %v1282_v55 = vmul.f32 0.0, %v2582_v52 }
0x13ad   :  { %v1285_v53 = vpop.permute.xlu0 %1284 }
0x13ae   :  { %v1287_v54 = vmul.f32 %v2582_v52, %v1285_v53  ;;  %v1140_v53 = vadd.f32 %v3225_v24, %v3217_v3 }
0x13b0   :  { %1289 = vrot.lane.b32.xlu1 %v1287_v54, %s2801_s3 }
0x1422   :  { %v1290_v56 = vpop.permute.xlu1 %1289 }
0x1423   :  { %v1292_v57 = vadd.f32 %v1290_v56, %v1282_v55 }
0x1425   :  { %2583 = vtanh.f32 %v1292_v57 }
0x1426   :  { %2585 = vpow2.f32 %v2310_v37 }
0x1432   :  { %v2584_v58 = vpop.eup %2583 }
0x1433   :  { %1295 = vrot.lane.b32.xlu0 %v2584_v58, %s2801_s3  ;;  %v2586_v59 = vpop.eup %2585 }
0x1434   :  { %v1276_v60 = vadd.f32 1.0, %v2586_v59 }
0x1436   :  { %2587 = vrcp.f32 %v1276_v60 }
0x1443   :  { %v2588_v61 = vpop.eup %2587 }
0x14a5   :  { %v1296_v33 = vpop.permute.xlu0 %1295 }
0x14a6   :  { %v1298_v62 = vmul.f32 %v2588_v61, %v1296_v33 }
0x14a8   :  { %v1303_v34 = vpack.c.bf16 %v1298_v62, %v1298_v62 }
0x14aa   :  { %2311 = vmatmul.mubr.msk.bf16.vlgmr.msra.gmra.mxu1 %vm334_vm2, %v1303_v34 }
0x14ab   :  { %1478 = vmatpush1.bf16.msra.mxu1 %v3135_v40  ;;  %1501 = vmatprep.mubr.bf16.mxu1 %v2800_v0 }
0x14ac   :  { %1479 = vmatprep.subr.bf16.mxu1 %v3143_v12 }
0x14af   :  { %1480 = vmatpush1.bf16.msra.mxu1 %v3147_v13 }
0x14b0   :  { %1481 = vmatprep.subr.bf16.mxu1 %v3154_v28 }
0x14b3   :  { %1482 = vmatpush1.bf16.msra.mxu1 %v3159_v30 }
0x14b4   :  { %1483 = vmatprep.subr.bf16.mxu1 %v3169_v41 }
0x14b7   :  { %1484 = vmatpush1.bf16.msra.mxu1 %v3171_v42 }
0x14b8   :  { %1639 = vmatprep.subr.bf16.mxu1 %v3133_v22 }
0x156a   :  { %v1341_v63 = vpop.f32.mrf.mxu1 }
0x156b   :  { %v1348_v5 = vadd.f32 %v1341_v63, %v3221_v20 }
0x156c   :  { %v1343_v7 = vpop.f32.mrf.mxu1 }
0x156d   :  { %v1349_v9 = vadd.f32 %v1343_v7, %v1134_v1  ;;  %v2312_v23 = vmul.f32 -1.442695, %v1348_v5 }
0x156e   :  { %v1345_v14 = vpop.f32.mrf.mxu1 }
0x156f   :  { %2589 = vtanh.f32 %v1349_v9  ;;  %v2313_v31 = vmul.f32 -1.442695, %v1349_v9 }
0x1570   :  { %v1346_v15 = vpop.f32.mrf.mxu1  ;;  %2591 = vpow2.f32 %v2312_v23 }
0x157c   :  { %v2590_v17 = vpop.eup %2589 }
0x157d   :  { %1365 = vrot.lane.b32.xlu1 %v2590_v17, %s2801_s3  ;;  %v2592_v25 = vpop.eup %2591 }
0x157e   :  { %v1356_v26 = vadd.f32 1.0, %v2592_v25 }
0x1580   :  { %2593 = vrcp.f32 %v1356_v26 }
0x158d   :  { %v2594_v39 = vpop.eup %2593 }
0x158e   :  { %v1363_v21 = vmul.f32 %v2594_v39, %v1292_v57 }
0x15ef   :  { %v1366_v10 = vpop.permute.xlu1 %1365 }
0x15f0   :  { %v1368_v27 = vmul.f32 %v2594_v39, %v1366_v10 }
0x15f2   :  { %1370 = vrot.lane.b32.xlu0 %v1368_v27, %s2801_s3 }
0x1664   :  { %v1371_v20 = vpop.permute.xlu0 %1370 }
0x1665   :  { %v1373_v35 = vadd.f32 %v1371_v20, %v1363_v21 }
0x1667   :  { %2595 = vtanh.f32 %v1373_v35 }
0x1668   :  { %2597 = vpow2.f32 %v2313_v31 }
0x1674   :  { %v2596_v36 = vpop.eup %2595 }
0x1675   :  { %1376 = vrot.lane.b32.xlu1 %v2596_v36, %s2801_s3  ;;  %v2598_v43 = vpop.eup %2597 }
0x1676   :  { %v1357_v45 = vadd.f32 1.0, %v2598_v43 }
0x1678   :  { %2599 = vrcp.f32 %v1357_v45 }
0x1685   :  { %v2600_v47 = vpop.eup %2599 }
0x16e7   :  { %v1377_v48 = vpop.permute.xlu1 %1376 }
0x16e8   :  { %v1379_v49 = vmul.f32 %v2600_v47, %v1377_v48 }
0x16ea   :  { %v1384_v50 = vpack.c.bf16 %v1379_v49, %v1379_v49 }
0x16ec   :  { %2314 = vmatmul.mubr.msk.bf16.vlgmr.msra.gmra.mxu0 %vm334_vm2, %v1384_v50 }
0x16ed   :  { %1559 = vmatpush1.bf16.msra.mxu0 %v3135_v40  ;;  %1582 = vmatprep.mubr.bf16.mxu0 %v2800_v0 }
0x16ee   :  { %1560 = vmatprep.subr.bf16.mxu0 %v3143_v12 }
0x16f1   :  { %1561 = vmatpush1.bf16.msra.mxu0 %v3147_v13 }
0x16f2   :  { %1562 = vmatprep.subr.bf16.mxu0 %v3154_v28 }
0x16f5   :  { %1563 = vmatpush1.bf16.msra.mxu0 %v3159_v30 }
0x16f6   :  { %1564 = vmatprep.subr.bf16.mxu0 %v3169_v41 }
0x16f9   :  { %1565 = vmatpush1.bf16.msra.mxu0 %v3171_v42 }
0x16fa   :  { %1720 = vmatprep.subr.bf16.mxu0 %v3133_v22 }
0x17ac   :  { %v1422_v52 = vpop.f32.mrf.mxu0 }
0x17ad   :  { %v1429_v54 = vadd.f32 %v1422_v52, %v3223_v4 }
0x17ae   :  { %v1424_v55 = vpop.f32.mrf.mxu0 }
0x17af   :  { %v1430_v56 = vadd.f32 %v1424_v55, %v1140_v53  ;;  %v2315_v59 = vmul.f32 -1.442695, %v1429_v54 }
0x17b0   :  { %v1426_v57 = vpop.f32.mrf.mxu0 }
0x17b1   :  { %2601 = vtanh.f32 %v1430_v56  ;;  %v2316_v5 = vmul.f32 -1.442695, %v1430_v56 }
0x17b2   :  { %v1427_v58 = vpop.f32.mrf.mxu0  ;;  %2603 = vpow2.f32 %v2315_v59 }
0x17be   :  { %v2602_v37 = vpop.eup %2601 }
0x17bf   :  { %1446 = vrot.lane.b32.xlu0 %v2602_v37, %s2801_s3  ;;  %v2604_v60 = vpop.eup %2603 }
0x17c0   :  { %v1437_v61 = vadd.f32 1.0, %v2604_v60 }
0x17c2   :  { %2605 = vrcp.f32 %v1437_v61 }
0x17cf   :  { %v2606_v33 = vpop.eup %2605 }
0x17d0   :  { %v1444_v24 = vmul.f32 %v2606_v33, %v1373_v35 }
0x1831   :  { %v1447_v62 = vpop.permute.xlu0 %1446 }
0x1832   :  { %v1449_v34 = vmul.f32 %v2606_v33, %v1447_v62 }
0x1834   :  { %1451 = vrot.lane.b32.xlu1 %v1449_v34, %s2801_s3 }
0x18a6   :  { %v1452_v4 = vpop.permute.xlu1 %1451 }
0x18a7   :  { %v1454_v63 = vadd.f32 %v1452_v4, %v1444_v24 }
0x18a9   :  { %2607 = vtanh.f32 %v1454_v63 }
0x18aa   :  { %2609 = vpow2.f32 %v2316_v5 }
0x18b6   :  { %v2608_v1 = vpop.eup %2607 }
0x18b7   :  { %1457 = vrot.lane.b32.xlu0 %v2608_v1, %s2801_s3  ;;  %v2610_v7 = vpop.eup %2609 }
0x18b8   :  { %v1438_v9 = vadd.f32 1.0, %v2610_v7 }
0x18ba   :  { %2611 = vrcp.f32 %v1438_v9 }
0x18c7   :  { %v2612_v14 = vpop.eup %2611 }
0x1929   :  { %v1458_v15 = vpop.permute.xlu0 %1457 }
0x192a   :  { %v1460_v17 = vmul.f32 %v2612_v14, %v1458_v15 }
0x192c   :  { %v1465_v23 = vpack.c.bf16 %v1460_v17, %v1460_v17 }
0x192e   :  { %2317 = vmatmul.mubr.msk.bf16.vlgmr.msra.gmra.mxu1 %vm334_vm2, %v1465_v23 }
0x192f   :  { %1640 = vmatpush1.bf16.msra.mxu1 %v3135_v40  ;;  %1663 = vmatprep.mubr.bf16.mxu1 %v2800_v0 }
0x1930   :  { %1641 = vmatprep.subr.bf16.mxu1 %v3143_v12 }
0x1933   :  { %1642 = vmatpush1.bf16.msra.mxu1 %v3147_v13 }
0x1934   :  { %1643 = vmatprep.subr.bf16.mxu1 %v3154_v28 }
0x1937   :  { %1644 = vmatpush1.bf16.msra.mxu1 %v3159_v30 }
0x1938   :  { %1645 = vmatprep.subr.bf16.mxu1 %v3169_v41 }
0x193b   :  { %1646 = vmatpush1.bf16.msra.mxu1 %v3171_v42 }
0x193c   :  { %1801 = vmatprep.subr.bf16.mxu1 %v3133_v22 }
0x19ee   :  { %v1503_v25 = vpop.f32.mrf.mxu1 }
0x19ef   :  { %v1510_v26 = vadd.f32 %v1503_v25, %v3227_v6 }
0x19f0   :  { %v1505_v39 = vpop.f32.mrf.mxu1 }
0x19f1   :  { %v1511_v10 = vadd.f32 %v1505_v39, %v3230_v18  ;;  %v2318_v35 = vmul.f32 -1.442695, %v1510_v26 }
0x19f2   :  { %v1507_v27 = vpop.f32.mrf.mxu1 }
0x19f3   :  { %2613 = vtanh.f32 %v1511_v10  ;;  %v2319_v49 = vmul.f32 -1.442695, %v1511_v10 }
0x19f4   :  { %v1508_v21 = vpop.f32.mrf.mxu1  ;;  %2615 = vpow2.f32 %v2318_v35 }
0x1a00   :  { %v2614_v20 = vpop.eup %2613 }
0x1a01   :  { %1527 = vrot.lane.b32.xlu1 %v2614_v20, %s2801_s3  ;;  %v2616_v36 = vpop.eup %2615 }
0x1a02   :  { %v1518_v31 = vadd.f32 1.0, %v2616_v36 }
0x1a04   :  { %2617 = vrcp.f32 %v1518_v31 }
0x1a11   :  { %v2618_v43 = vpop.eup %2617 }
0x1a12   :  { %v1525_v6 = vmul.f32 %v2618_v43, %v1454_v63 }
0x1a73   :  { %v1528_v45 = vpop.permute.xlu1 %1527 }
0x1a74   :  { %v1530_v22 = vmul.f32 %v2618_v43, %v1528_v45 }
0x1a76   :  { %1532 = vrot.lane.b32.xlu0 %v1530_v22, %s2801_s3 }
0x1ae8   :  { %v1533_v47 = vpop.permute.xlu0 %1532 }
0x1ae9   :  { %v1535_v48 = vadd.f32 %v1533_v47, %v1525_v6 }
0x1aeb   :  { %2619 = vtanh.f32 %v1535_v48 }
0x1aec   :  { %2621 = vpow2.f32 %v2319_v49  ;;  %v2459_v49 = vld [vmem:[#allocation10 + $0x30] ss:$8 sps:$4 sm:$0xff]  }
0x1af8   :  { %v2620_v18 = vpop.eup %2619 }
0x1af9   :  { %1538 = vrot.lane.b32.xlu1 %v2620_v18, %s2801_s3  ;;  %v2622_v50 = vpop.eup %2621 }
0x1afa   :  { %v1519_v52 = vadd.f32 1.0, %v2622_v50 }
0x1afc   :  { %2623 = vrcp.f32 %v1519_v52  ;;  %v2464_v52 = vld [vmem:[#allocation10 + $0x24] ss:$8 sps:$4 sm:$0xff]  }
0x1b09   :  { %v2624_v53 = vpop.eup %2623 }
0x1b6b   :  { %v1539_v54 = vpop.permute.xlu1 %1538 }
0x1b6c   :  { %v1541_v55 = vmul.f32 %v2624_v53, %v1539_v54  ;;  %v2462_v53 = vld [vmem:[#allocation10 + $0x20] ss:$8 sps:$4 sm:$0xff]   ;;  %v2467_v54 = vld [vmem:[#allocation10 + $0x14] ss:$8 sps:$4 sm:$0xff]  }
0x1b6e   :  { %v1546_v56 = vpack.c.bf16 %v1541_v55, %v1541_v55  ;;  %v2465_v55 = vld [vmem:[#allocation10 + $0x10] ss:$8 sps:$4 sm:$0xff]  }
0x1b70   :  { %2320 = vmatmul.mubr.msk.bf16.vlgmr.msra.gmra.mxu0 %vm334_vm2, %v1546_v56  ;;  %v2470_v56 = vld [vmem:[#allocation10 + $0x4] ss:$8 sps:$4 sm:$0xff]  }
0x1b71   :  { %1721 = vmatpush1.bf16.msra.mxu0 %v3135_v40  ;;  %1744 = vmatprep.mubr.bf16.mxu0 %v2800_v0 }
0x1b72   :  { %1722 = vmatprep.subr.bf16.mxu0 %v3143_v12 }
0x1b75   :  { %1723 = vmatpush1.bf16.msra.mxu0 %v3147_v13 }
0x1b76   :  { %1724 = vmatprep.subr.bf16.mxu0 %v3154_v28 }
0x1b79   :  { %1725 = vmatpush1.bf16.msra.mxu0 %v3159_v30 }
0x1b7a   :  { %1726 = vmatprep.subr.bf16.mxu0 %v3169_v41 }
0x1b7d   :  { %1727 = vmatpush1.bf16.msra.mxu0 %v3171_v42 }
0x1c30   :  { %v1584_v57 = vpop.f32.mrf.mxu0 }
0x1c31   :  { %v1591_v58 = vadd.f32 %v1584_v57, %v3232_v8  ;;  %v2468_v57 = vld [vmem:[#allocation10] ss:$8 sps:$4 sm:$0xff]  }
0x1c32   :  { %v1586_v37 = vpop.f32.mrf.mxu0 }
0x1c33   :  { %v1592_v59 = vadd.f32 %v1586_v37, %v3235_v11  ;;  %v2321_v62 = vmul.f32 -1.442695, %v1591_v58  ;;  %v1867_v58 = vpack.c.bf16 %v3211_v38, %v3211_v38 }
0x1c34   :  { %v1588_v60 = vpop.f32.mrf.mxu0 }
0x1c35   :  { %2625 = vtanh.f32 %v1592_v59  ;;  %v2322_v9 = vmul.f32 -1.442695, %v1592_v59 }
0x1c36   :  { %v1589_v61 = vpop.f32.mrf.mxu0  ;;  %2627 = vpow2.f32 %v2321_v62  ;;  %v1876_v62 = vld [vmem:[#allocation12] sm:$0x3] }
0x1c42   :  { %v2626_v33 = vpop.eup %2625 }
0x1c43   :  { %1608 = vrot.lane.b32.xlu0 %v2626_v33, %s2801_s3  ;;  %v2628_v34 = vpop.eup %2627 }
0x1c44   :  { %v1599_v24 = vadd.f32 1.0, %v2628_v34  ;;  %v1881_v34 = vrot.slane %v1876_v62, %v2976_v16  ;;  %v1885_v16 = vrot.slane %v1876_v62, %v2981_v19  ;;  %v2475_v62 = vld [vmem:[%s3418_s9 + $0x18] sm:$0xff]  }
0x1c46   :  { %2629 = vrcp.f32 %v1599_v24 }
0x1c53   :  { %v2630_v4 = vpop.eup %2629 }
0x1c54   :  { %v1606_v8 = vmul.f32 %v2630_v4, %v1535_v48 }
0x1cb5   :  { %v1609_v63 = vpop.permute.xlu0 %1608 }
0x1cb6   :  { %v1611_v1 = vmul.f32 %v2630_v4, %v1609_v63 }
0x1cb8   :  { %1613 = vrot.lane.b32.xlu1 %v1611_v1, %s2801_s3 }
0x1d2a   :  { %v1614_v5 = vpop.permute.xlu1 %1613 }
0x1d2b   :  { %v1616_v7 = vadd.f32 %v1614_v5, %v1606_v8 }
0x1d2d   :  { %2631 = vtanh.f32 %v1616_v7 }
0x1d2e   :  { %2633 = vpow2.f32 %v2322_v9 }
0x1d3a   :  { %v2632_v11 = vpop.eup %2631 }
0x1d3b   :  { %1619 = vrot.lane.b32.xlu0 %v2632_v11, %s2801_s3  ;;  %v2634_v14 = vpop.eup %2633 }
0x1d3c   :  { %v1600_v15 = vadd.f32 1.0, %v2634_v14 }
0x1d3e   :  { %2635 = vrcp.f32 %v1600_v15 }
0x1d4b   :  { %v2636_v17 = vpop.eup %2635 }
0x1dad   :  { %v1620_v23 = vpop.permute.xlu0 %1619 }
0x1dae   :  { %v1622_v25 = vmul.f32 %v2636_v17, %v1620_v23 }
0x1db0   :  { %v1627_v26 = vpack.c.bf16 %v1622_v25, %v1622_v25 }
0x1db2   :  { %2323 = vmatmul.mubr.msk.bf16.vlgmr.msra.gmra.mxu1 %vm334_vm2, %v1627_v26 }
0x1db3   :  { %1802 = vmatpush1.bf16.msra.mxu1 %v3135_v40  ;;  %1825 = vmatprep.mubr.bf16.mxu1 %v2800_v0 }
0x1db4   :  { %1803 = vmatprep.subr.bf16.mxu1 %v3143_v12 }
0x1db7   :  { %1804 = vmatpush1.bf16.msra.mxu1 %v3147_v13 }
0x1db8   :  { %1805 = vmatprep.subr.bf16.mxu1 %v3154_v28 }
0x1dbb   :  { %1806 = vmatpush1.bf16.msra.mxu1 %v3159_v30 }
0x1dbc   :  { %1807 = vmatprep.subr.bf16.mxu1 %v3169_v41 }
0x1dbf   :  { %1808 = vmatpush1.bf16.msra.mxu1 %v3171_v42 }
0x1e72   :  { %v1665_v39 = vpop.f32.mrf.mxu1 }
0x1e73   :  { %v1672_v10 = vadd.f32 %v1665_v39, %v3237_v2 }
0x1e74   :  { %v1667_v27 = vpop.f32.mrf.mxu1 }
0x1e75   :  { %v1673_v40 = vadd.f32 %v1667_v27, %v3241_v29  ;;  %v2324_v13 = vmul.f32 -1.442695, %v1672_v10  ;;  %v2461_v29 = vld [vmem:[#allocation10 + $0x34] ss:$8 sps:$4 sm:$0xff]  }
0x1e76   :  { %v1669_v21 = vpop.f32.mrf.mxu1  ;;  %1939 = vmatprep.subr.bf16.mxu0 %v2461_v29 }
0x1e77   :  { %2637 = vtanh.f32 %v1673_v40  ;;  %v2325_v45 = vmul.f32 -1.442695, %v1673_v40 }
0x1e78   :  { %v1670_v20 = vpop.f32.mrf.mxu1  ;;  %2639 = vpow2.f32 %v2324_v13 }
0x1e84   :  { %v2638_v12 = vpop.eup %2637 }
0x1e85   :  { %1689 = vrot.lane.b32.xlu1 %v2638_v12, %s2801_s3  ;;  %v2640_v28 = vpop.eup %2639 }
0x1e86   :  { %v1680_v30 = vadd.f32 1.0, %v2640_v28 }
0x1e88   :  { %2641 = vrcp.f32 %v1680_v30 }
0x1e95   :  { %v2642_v41 = vpop.eup %2641 }
0x1e96   :  { %v1687_v2 = vmul.f32 %v2642_v41, %v1616_v7 }
0x1ef7   :  { %v1690_v35 = vpop.permute.xlu1 %1689 }
0x1ef8   :  { %v1692_v42 = vmul.f32 %v2642_v41, %v1690_v35 }
0x1efa   :  { %1694 = vrot.lane.b32.xlu0 %v1692_v42, %s2801_s3  ;;  %v2471_v42 = vld [vmem:[%s3419_s10 + $0x18] sm:$0xff]  }
0x1f6c   :  { %v1695_v36 = vpop.permute.xlu0 %1694 }
0x1f6d   :  { %v1697_v31 = vadd.f32 %v1695_v36, %v1687_v2  ;;  %v2802_v2 = vmov 0.0   ;;  %v2472_v36 = vld [vmem:[%s3419_s10 + $0x10] sm:$0xff]  }
0x1f6e   :  { %2370 = vmatprep.subr.bf16.mxu1 %v2802_v2 }
0x1f6f   :  { %2643 = vtanh.f32 %v1697_v31 }
0x1f70   :  { %2645 = vpow2.f32 %v2325_v45 }
0x1f7c   :  { %v2644_v43 = vpop.eup %2643 }
0x1f7d   :  { %1700 = vrot.lane.b32.xlu1 %v2644_v43, %s2801_s3  ;;  %v2646_v22 = vpop.eup %2645 }
0x1f7e   :  { %v1681_v6 = vadd.f32 1.0, %v2646_v22  ;;  %v2474_v22 = vld [vmem:[%s3419_s10] sm:$0xff]  }
0x1f80   :  { %2647 = vrcp.f32 %v1681_v6 }
0x1f8d   :  { %v2648_v47 = vpop.eup %2647 }
0x1fef   :  { %v1701_v48 = vpop.permute.xlu1 %1700 }
0x1ff0   :  { %v1703_v18 = vmul.f32 %v2648_v47, %v1701_v48  ;;  %v1164_v48 = vadd.f32 %v3277_v51, %v3217_v3 }
0x1ff2   :  { %v1708_v50 = vpack.c.bf16 %v1703_v18, %v1703_v18 }
0x1ff4   :  { %2326 = vmatmul.mubr.msk.bf16.vlgmr.msra.gmra.mxu0 %vm334_vm2, %v1708_v50 }
0x1ff5   :  { %1940 = vmatpush1.bf16.msra.mxu0 %v2459_v49  ;;  %1963 = vmatprep.mubr.bf16.mxu0 %v2800_v0 }
0x1ff6   :  { %1941 = vmatprep.subr.bf16.mxu0 %v2464_v52 }
0x1ff9   :  { %1942 = vmatpush1.bf16.msra.mxu0 %v2462_v53 }
0x1ffa   :  { %1943 = vmatprep.subr.bf16.mxu0 %v2467_v54 }
0x1ffd   :  { %1944 = vmatpush1.bf16.msra.mxu0 %v2465_v55 }
0x1ffe   :  { %1945 = vmatprep.subr.bf16.mxu0 %v2470_v56 }
0x2001   :  { %1946 = vmatpush1.bf16.msra.mxu0 %v2468_v57 }
0x2002   :  { %2382 = vmatprep.subr.bf16.mxu0 %v2802_v2 }
0x2004   :  { %2340 = vmatmul.mubr.msk.bf16.vlgmr.msra.gmra.mxu0 %vm334_vm2, %v1867_v58 }
0x2005   :  { %2390 = vmatprep.mubr.msk.bf16.mxu0 %vm2803_vm3, %v2802_v2  ;;  %2383 = vmatpush3.bf16.msra.mxu0 %v2475_v62 }
0x2006   :  { %2384 = vmatprep.subr.bf16.mxu0 %v2802_v2 }
0x20b4   :  { %v1746_v37 = vpop.f32.mrf.mxu0 }
0x20b5   :  { %v1753_v59 = vadd.f32 %v1746_v37, %v3243_v32 }
0x20b6   :  { %v1748_v60 = vpop.f32.mrf.mxu0 }
0x20b7   :  { %v1754_v0 = vadd.f32 %v1748_v60, %v3246_v44  ;;  %v2327_v5 = vmul.f32 -1.442695, %v1753_v59 }
0x20b8   :  { %v1750_v61 = vpop.f32.mrf.mxu0 }
0x20b9   :  { %2649 = vtanh.f32 %v1754_v0  ;;  %v2328_v39 = vmul.f32 -1.442695, %v1754_v0 }
0x20ba   :  { %v1751_v33 = vpop.f32.mrf.mxu0  ;;  %2651 = vpow2.f32 %v2327_v5 }
0x20c4   :  { %v1965_v24 = vpop.f32.mrf.mxu0 }
0x20c5   :  { %v1966_v4 = vadd.f32 %v1965_v24, %v1881_v34  ;;  %v2476_v34 = vld [vmem:[%s3418_s9 + $0x10] sm:$0xff]   ;;  %v2477_v24 = vld [vmem:[%s3418_s9 + $0x8] sm:$0xff]  }
0x20c6   :  { %v1967_v63 = vpop.f32.mrf.mxu0  ;;  %v2650_v1 = vpop.eup %2649  ;;  %2385 = vmatpush3.bf16.msra.mxu0 %v2476_v34 }
0x20c7   :  { %1770 = vrot.lane.b32.xlu0 %v2650_v1, %s2801_s3  ;;  %v2652_v32 = vpop.eup %2651  ;;  %v1968_v23 = vadd.f32 %v1967_v63, %v1885_v16  ;;  %v2341_v10 = vmul.f32 -1.442695, %v1966_v4  ;;  %2386 = vmatprep.subr.bf16.mxu0 %v2802_v2 }
0x20c8   :  { %v1969_v38 = vpop.f32.mrf.mxu0  ;;  %v1761_v7 = vadd.f32 1.0, %v2652_v32  ;;  %v2478_v32 = vld [vmem:[%s3418_s9] sm:$0xff]  }
0x20c9   :  { %v2342_v54 = vmul.f32 -1.442695, %v1968_v23 }
0x20ca   :  { %v1970_v8 = vpop.f32.mrf.mxu0  ;;  %2653 = vrcp.f32 %v1761_v7  ;;  %2387 = vmatpush3.bf16.msra.mxu0 %v2477_v24 }
0x20cb   :  { %2388 = vmatprep.subr.bf16.mxu0 %v2802_v2 }
0x20ce   :  { %2389 = vmatpush3.bf16.msra.mxu0 %v2478_v32 }
0x20d7   :  { %v2654_v44 = vpop.eup %2653 }
0x20d8   :  { %v1768_v14 = vmul.f32 %v2654_v44, %v1697_v31  ;;  %v2473_v31 = vld [vmem:[%s3419_s10 + $0x8] sm:$0xff]  }
0x2139   :  { %v1771_v11 = vpop.permute.xlu0 %1770 }
0x213a   :  { %v1773_v9 = vmul.f32 %v2654_v44, %v1771_v11 }
0x213c   :  { %1775 = vrot.lane.b32.xlu1 %v1773_v9, %s2801_s3 }
0x21ae   :  { %v1776_v15 = vpop.permute.xlu1 %1775 }
0x21af   :  { %v3339_v17 = vadd.f32 %v1776_v15, %v1768_v14 }
0x21b1   :  { %2655 = vtanh.f32 %v3339_v17 }
0x21b2   :  { %2657 = vtanh.f32 %v1968_v23 }
0x21b3   :  { %2659 = vpow2.f32 %v2328_v39 }
0x21b4   :  { %2661 = vpow2.f32 %v2341_v10  ;;  %v2353_v10 = vld [vmem:[%s3420_s11] ss:$0 sm:$0xff] }
0x21be   :  { %v2656_v25 = vpop.eup %2655 }
0x21bf   :  { %1781 = vrot.lane.b32.xlu0 %v2656_v25, %s2801_s3  ;;  %v2658_v26 = vpop.eup %2657  ;;  %v2479_v25 = vld [vmem:[%s3421_s12 + $0x8] sm:$0xff]  }
0x21c0   :  { %v2660_v27 = vpop.eup %2659 }
0x21c1   :  { %v1762_v19 = vadd.f32 1.0, %v2660_v27  ;;  %v2662_v40 = vpop.eup %2661 }
0x21c2   :  { %v1978_v21 = vadd.f32 1.0, %v2662_v40 }
0x21c3   :  { %1987 = vrot.lane.b32.xlu0 %v2658_v26, %s2801_s3  ;;  %2663 = vrcp.f32 %v1762_v19  ;;  %v2480_v26 = vld [vmem:[%s3421_s12] sm:$0xff]  }
0x21c4   :  { %2665 = vrcp.f32 %v1978_v21 }
0x21d0   :  { %v2664_v20 = vpop.eup %2663 }
0x21d1   :  { %v2666_v30 = vpop.eup %2665 }
0x21d2   :  { %v1985_v29 = vmul.f32 0.0, %v2666_v30 }
0x2231   :  { %v1782_v12 = vpop.permute.xlu0 %1781 }
0x2232   :  { %v1784_v13 = vmul.f32 %v2664_v20, %v1782_v12 }
0x2234   :  { %v1789_v28 = vpack.c.bf16 %v1784_v13, %v1784_v13 }
0x2235   :  { %v1988_v41 = vpop.permute.xlu0 %1987 }
0x2236   :  { %v1990_v35 = vmul.f32 %v2666_v30, %v1988_v41  ;;  %2329 = vmatmul.mubr.msk.bf16.vlgmr.msra.gmra.mxu1 %vm334_vm2, %v1789_v28 }
0x2237   :  { %2371 = vmatpush3.bf16.msra.mxu1 %v2471_v42  ;;  %2378 = vmatprep.mubr.msk.bf16.mxu1 %vm2803_vm3, %v2802_v2 }
0x2238   :  { %1992 = vrot.lane.b32.xlu0 %v1990_v35, %s2801_s3  ;;  %2372 = vmatprep.subr.bf16.mxu1 %v2802_v2 }
0x223b   :  { %2373 = vmatpush3.bf16.msra.mxu1 %v2472_v36 }
0x223c   :  { %2374 = vmatprep.subr.bf16.mxu1 %v2802_v2 }
0x223f   :  { %2375 = vmatpush3.bf16.msra.mxu1 %v2473_v31 }
0x2240   :  { %2376 = vmatprep.subr.bf16.mxu1 %v2802_v2 }
0x2243   :  { %2377 = vmatpush3.bf16.msra.mxu1 %v2474_v22 }
0x2244   :  { %2394 = vmatprep.subr.bf16.mxu1 %v2802_v2 }
0x22aa   :  { %v1993_v43 = vpop.permute.xlu0 %1992 }
0x22ab   :  { %v1995_v45 = vadd.f32 %v1993_v43, %v1985_v29 }
0x22ad   :  { %2667 = vtanh.f32 %v1995_v45 }
0x22ba   :  { %v2668_v6 = vpop.eup %2667 }
0x22bb   :  { %1998 = vrot.lane.b32.xlu0 %v2668_v6, %s2801_s3 }
0x22f6   :  { %v1827_v47 = vpop.f32.mrf.mxu1 }
0x22f7   :  { %v1834_v18 = vadd.f32 %v1827_v47, %v3248_v46 }
0x22f8   :  { %v1829_v49 = vpop.f32.mrf.mxu1 }
0x22f9   :  { %v1835_v50 = vadd.f32 %v1829_v49, %v1164_v48  ;;  %v2330_v3 = vmul.f32 -1.442695, %v1834_v18 }
0x22fa   :  { %v1831_v52 = vpop.f32.mrf.mxu1 }
0x22fb   :  { %2669 = vtanh.f32 %v1835_v50  ;;  %v2331_v11 = vmul.f32 -1.442695, %v1835_v50 }
0x22fc   :  { %v1832_v53 = vpop.f32.mrf.mxu1  ;;  %2671 = vpow2.f32 %v2342_v54 }
0x2308   :  { %v2670_v55 = vpop.eup %2669 }
0x2309   :  { %1851 = vrot.lane.b32.xlu1 %v2670_v55, %s2801_s3  ;;  %v2672_v56 = vpop.eup %2671 }
0x230a   :  { %v1979_v57 = vadd.f32 1.0, %v2672_v56 }
0x230c   :  { %2673 = vrcp.f32 %v1979_v57 }
0x230d   :  { %2675 = vpow2.f32 %v2330_v3 }
0x2319   :  { %v2674_v58 = vpop.eup %2673 }
0x231a   :  { %v2676_v46 = vpop.eup %2675 }
0x231b   :  { %v1842_v51 = vadd.f32 1.0, %v2676_v46 }
0x231d   :  { %2677 = vrcp.f32 %v1842_v51 }
0x232a   :  { %v2678_v0 = vpop.eup %2677 }
0x232b   :  { %v1849_v4 = vmul.f32 %v2678_v0, %v3339_v17 }
0x232d   :  { %v1999_v37 = vpop.permute.xlu0 %1998 }
0x232e   :  { %v2001_v59 = vmul.f32 %v2674_v58, %v1999_v37 }
0x2330   :  { %v2011_v60 = vpack.c.bf16 %v2001_v59, %v2001_v59 }
0x2332   :  { %2379 = vmatmul.mubr.msk.bf16.vlgmr.msra.gmra.mxu1 %vm334_vm2, %v2011_v60 }
0x2333   :  { %2398 = vmatprep.mubr.msk.bf16.mxu1 %vm2803_vm3, %v2802_v2  ;;  %2395 = vmatpush3.bf16.msra.mxu1 %v2479_v25 }
0x2334   :  { %2396 = vmatprep.subr.bf16.mxu1 %v2802_v2 }
0x2337   :  { %2397 = vmatpush3.bf16.msra.mxu1 %v2480_v26 }
0x237b   :  { %v1852_v61 = vpop.permute.xlu1 %1851 }
0x237c   :  { %v1854_v33 = vmul.f32 %v2678_v0, %v1852_v61 }
0x237e   :  { %1856 = vrot.lane.b32.xlu1 %v1854_v33, %s2801_s3 }
0x23f0   :  { %v1857_v63 = vpop.permute.xlu1 %1856 }
0x23f1   :  { %v1859_v1 = vadd.f32 %v1857_v63, %v1849_v4 }
0x23f2   :  { %v2081_v38 = vpop.f32.mrf.mxu1 }
0x23f3   :  { %2679 = vtanh.f32 %v1859_v1 }
0x23f4   :  { %v2380_v8 = vpop.f32.mrf.mxu1  ;;  %2681 = vpow2.f32 %v2331_v11 }
0x23f6   :  { %v2084_v5 = vpop.f32.mrf.mxu1 }
0x23f8   :  { %v2381_v7 = vpop.f32.mrf.mxu1 }
0x2400   :  { %v2680_v44 = vpop.eup %2679 }
0x2401   :  { %1862 = vrot.lane.b32.xlu1 %v2680_v44, %s2801_s3  ;;  %v2682_v9 = vpop.eup %2681 }
0x2402   :  { %v1843_v16 = vadd.f32 1.0, %v2682_v9 }
0x2404   :  { %2683 = vrcp.f32 %v1843_v16 }
0x2411   :  { %v2684_v14 = vpop.eup %2683 }
0x2473   :  { %v1863_v15 = vpop.permute.xlu1 %1862 }
0x2474   :  { %v1865_v17 = vmul.f32 %v2684_v14, %v1863_v15 }
0x2476   :  { %v2002_v23 = vpack.c.bf16 %v1865_v17, %v1865_v17 }
0x2478   :  { %2391 = vmatmul.mubr.msk.bf16.vlgmr.msra.gmra.mxu0 %vm334_vm2, %v2002_v23 }
0x2538   :  { %v2148_v39 = vpop.f32.mrf.mxu0 }
0x2539   :  { %v2149_v27 = vadd.f32 %v2148_v39, %v2081_v38 }
0x253a   :  { %v2392_v19 = vpop.f32.mrf.mxu0 }
0x253b   :  { %v2161_v40 = vadd.f32 %v2353_v10, %v2149_v27 }
0x253c   :  { %v2151_v21 = vpop.f32.mrf.mxu0 }
0x253d   :  { %2685 = vtanh.f32 %v2161_v40 }
0x253e   :  { %v2393_v20 = vpop.f32.mrf.mxu0 }
0x254a   :  { %v2686_v12 = vpop.eup %2685 }
0x254b   :  { %v2163_v13 = vpack.c.bf16 %v2686_v12, %v2686_v12 }
0x254d   :  { %2399 = vmatmul.mubr.msk.bf16.vlgmr.msra.gmra.mxu1 %vm187_vm0, %v2163_v13 }
0x260d   :  { %v2217_v28 = vpop.f32.mrf.mxu1 }
0x260e   :  { %2224 = vst.msk [vmem:[%s3422_s13] sm:$0xff] %vm2223_vm4, %v2217_v28 }
0x260f   :  { %v2400_v30 = vpop.f32.mrf.mxu1 }
0x2611   :  { %v2220_v41 = vpop.f32.mrf.mxu1 }
0x2613   :  { %v2401_v35 = vpop.f32.mrf.mxu1 }
0x2614   :  { %2229 = vsyncpa [#allocation6], 1 }
0x2615   :  { %2230 = vsyncpa [#allocation8], 1 }
0x2616   :  { %2231 = vsyncpa [#allocation11], 1 }

</bundles_post_ra>
